<compile_context>
chip_gen: v6e
topology: v6e:2x2x1
jax: 0.10.0
libtpu: 0.0.40
codegen_flags: <defaults>
</compile_context>

<pallas_src>
import math
from functools import partial

import jax
import jax.numpy as jnp
from jax.experimental import pallas as pl
from jax.experimental.pallas import tpu as pltpu


# ------------------------------ spec helpers -------------------------------

def _bcast_spec(shape):
    """Full-array block, identical for every grid step (weights / constants)."""
    zeros = (0,) * len(shape)
    return pl.BlockSpec(shape, lambda b: zeros)


_PAR = pltpu.CompilerParams(dimension_semantics=("parallel",))
_ARB = pltpu.CompilerParams(dimension_semantics=("arbitrary",))


# ---------------------------- in-kernel helpers ----------------------------

def _gelu_erf(x):
    """Exact (erf) GELU; erf via Abramowitz-Stegun 7.1.26, |err| <= 1.5e-7."""
    z = x * 0.7071067811865476
    az = jnp.abs(z)
    t = 1.0 / (1.0 + 0.3275911 * az)
    poly = t * (0.254829592 + t * (-0.284496736 + t * (1.421413741
               + t * (-1.453152027 + t * 1.061405429))))
    erf_az = 1.0 - poly * jnp.exp(-az * az)
    erf_z = jnp.where(z < 0.0, -erf_az, erf_az)
    return 0.5 * x * (1.0 + erf_z)


def _conv_taps(a, masks, W_img):
    """9 shifted+masked views of a (Cin, HW) slab for a 3x3/stride1/pad1 conv.

    Column l = h*W_img + w; tap (dh, dw) needs a[:, l + dh*W_img + dw], which
    is a static lane rotation (pltpu.roll, XLU) with out-of-image columns
    zeroed by the precomputed masks."""
    n = a.shape[1]
    taps = []
    for t in range(9):
        dh, dw = t // 3 - 1, t % 3 - 1
        s = dh * W_img + dw
        sh = pltpu.roll(a, shift=(-s) % n, axis=1) if s else a
        taps.append(sh * masks[t:t + 1, :])
    return taps


# ------------------------------ kernel 1 -----------------------------------
# Per batch image: GroupNorm(G, C) + SpatialAttention channel stats
# + ChannelAttention.

def _frontend_kernel(x_ref, g1_ref, b1_ref, caw1_ref, caw2_ref,
                     gmat_ref, emat_ref, xn_ref, stats_ref, ca_ref,
                     *, gs, eps):
    dot = partial(jnp.dot, preferred_element_type=jnp.float32)
    x = x_ref[...]                                        # (C, HW) f32

    # GroupNorm: per-group statistics over gs*HW elements of this image.
    mean_c = jnp.mean(x, axis=1, keepdims=True)           # (C, 1)
    if gs == 1:
        mean_map = mean_c
    else:
        mean_map = dot(emat_ref[...], dot(gmat_ref[...], mean_c))
    xc = x - mean_map
    var_c = jnp.mean(xc * xc, axis=1, keepdims=True)      # (C, 1)
    if gs == 1:
        inv_map = jax.lax.rsqrt(var_c + eps)
    else:
        inv_map = dot(emat_ref[...],
                      jax.lax.rsqrt(dot(gmat_ref[...], var_c) + eps))
    xn = xc * inv_map * g1_ref[...] + b1_ref[...]
    xn_ref[...] = xn

    # SpatialAttention statistics over channels: [min, mean, max].
    mn = jnp.min(xn, axis=0, keepdims=True)
    av = jnp.mean(xn, axis=0, keepdims=True)
    mx = jnp.max(xn, axis=0, keepdims=True)
    stats_ref[...] = jnp.concatenate([mn, av, mx], axis=0)

    # ChannelAttention: avg-pool -> FC -> ReLU -> FC -> sigmoid -> scale.
    y = jnp.mean(xn, axis=1, keepdims=True)               # (C, 1)
    h = jnp.maximum(dot(caw1_ref[...], y), 0.0)           # (C//2, 1)
    s = jax.nn.sigmoid(dot(caw2_ref[...], h))             # (C, 1)
    ca_ref[...] = xn * s


# ------------------------------ kernel 2 -----------------------------------
# PBMSA: (patch-embed folded) q/k/v -> MHA over the image-batch axis ->
# (out_proj folded) restore-embed.

def _pbmsa_kernel(patches_ref, wqkv_ref, bqkv_ref, seg_ref, segt_ref,
                  wore_ref, bore_ref, out_ref, *, B, Np, E):
    f32, bf16 = jnp.float32, jnp.bfloat16
    dot = partial(jnp.dot, preferred_element_type=f32)

    patches = patches_ref[...]                            # (B*Np, PPC) bf16
    # One fused matmul: patch-embed already folded into q/k/v, 1/sqrt(d) in q.
    qkv = dot(patches, wqkv_ref[...]) + bqkv_ref[...]     # (B*Np, 3E) f32
    q = qkv[:, :E]
    k = qkv[:, E:2 * E]
    v = qkv[:, 2 * E:3 * E]

    seg, segt = seg_ref[...], segt_ref[...]               # (E, H), (H, E)

    # nn.MultiheadAttention with batch_first=False sees (L=B, N=Np, E): the
    # softmax runs across the image-batch axis, per patch position and head.
    # All B*B per-head score products batched into one matmul.
    prods = []
    for i in range(B):
        qi = q[i * Np:(i + 1) * Np, :]
        for j in range(B):
            prods.append(qi * k[j * Np:(j + 1) * Np, :])
    scores = dot(jnp.concatenate(prods, axis=0), seg)     # (B*B*Np, nheads)

    w_blocks = []
    for i in range(B):
        sc = [scores[(i * B + j) * Np:(i * B + j + 1) * Np, :] for j in range(B)]
        m = sc[0]
        for t in sc[1:]:
            m = jnp.maximum(m, t)
        ex = [jnp.exp(t - m) for t in sc]
        den = ex[0]
        for t in ex[1:]:
            den = den + t
        inv = pl.reciprocal(den, approx=True)             # EUP reciprocal
        w_blocks.extend(e * inv for e in ex)
    pfull = dot(jnp.concatenate(w_blocks, axis=0), segt)  # (B*B*Np, E)

    outs = []
    for i in range(B):
        oi = None
        for j in range(B):
            t = (pfull[(i * B + j) * Np:(i * B + j + 1) * Np, :]
                 * v[j * Np:(j + 1) * Np, :])
            oi = t if oi is None else oi + t
        outs.append(oi)
    attn = jnp.concatenate(outs, axis=0)                  # (B*Np, E)

    # out_proj folded into restore-embed: one matmul back to patch pixels.
    out_ref[...] = dot(attn.astype(bf16), wore_ref[...]) + bore_ref[...]


# ------------------------------ kernel 3 -----------------------------------
# Per batch image: SA conv + sigmoid, concat, GroupNorm(1) + GELU,
# 3x3 conv (stacked im2col) + bias, LayerNorm.

def _tail_kernel(stats_ref, ca_ref, pb_ref, masks_ref, saw_ref,
                 g2_ref, b2_ref, cw_ref, cb_ref, lng_ref, lnb_ref, out_ref,
                 *, W_img, eps):
    dot = partial(jnp.dot, preferred_element_type=jnp.float32)
    stats = stats_ref[...]                                # (3, HW) f32
    masks = masks_ref[...]                                # (9, HW) f32
    saw = saw_ref[...]                                    # (3, 9)  f32

    # SpatialAttention 3x3 conv (3 -> 1, no bias): 27 VPU FMAs, no MXU.
    acc3 = None
    for t, sh in enumerate(_conv_taps(stats, masks, W_img)):
        term = saw[:, t:t + 1] * sh                       # (3,1) * (3,HW)
        acc3 = term if acc3 is None else acc3 + term
    sa = jax.nn.sigmoid(jnp.sum(acc3, axis=0, keepdims=True))   # (1, HW)

    # concat([sa, ca, pbmsa]) along the channel axis.
    act = jnp.concatenate([sa, ca_ref[...], pb_ref[...]], axis=0)  # (1+2C, HW)

    # GroupNorm(1, 1+2C) + per-channel affine, then exact GELU.
    m = jnp.mean(jnp.mean(act, axis=1, keepdims=True), axis=0, keepdims=True)
    act_c = act - m
    var = jnp.mean(jnp.mean(act_c * act_c, axis=1, keepdims=True),
                   axis=0, keepdims=True)
    act_n = act_c * jax.lax.rsqrt(var + eps) * g2_ref[...] + b2_ref[...]
    act_g = _gelu_erf(act_n)

    # 3x3 conv (1+2C -> C, bias): ONE stacked-im2col bf16 MXU matmul.
    im2col = jnp.concatenate(_conv_taps(act_g, masks, W_img),
                             axis=0).astype(jnp.bfloat16)        # (9*(1+2C), HW)
    conv = dot(cw_ref[...], im2col) + cb_ref[...]                # (C, HW) f32

    # LayerNorm over (C, H, W) per batch with element-wise affine.
    mu = jnp.mean(jnp.mean(conv, axis=1, keepdims=True), axis=0, keepdims=True)
    cc = conv - mu
    vv = jnp.mean(jnp.mean(cc * cc, axis=1, keepdims=True), axis=0, keepdims=True)
    out_ref[...] = cc * jax.lax.rsqrt(vv + eps) * lng_ref[...] + lnb_ref[...]


# ---------------------------- pallas_call wrappers --------------------------

def _frontend_call(x2d, prep, *, B, HW, G, eps=1e-5):
    C, _ = x2d.shape
    gs = C // G
    kern = partial(_frontend_kernel, gs=gs, eps=eps)
    outs = (jax.ShapeDtypeStruct((C, B * HW), jnp.float32),
            jax.ShapeDtypeStruct((3, B * HW), jnp.float32),
            jax.ShapeDtypeStruct((C, B * HW), jnp.float32))
    args = (x2d, prep['gn1_g'], prep['gn1_b'], prep['ca_w1'], prep['ca_w2'],
            prep['gmat'], prep['emat'])
    in_specs = ([pl.BlockSpec((C, HW), lambda b: (0, b))]
                + [_bcast_spec(a.shape) for a in args[1:]])
    out_specs = (pl.BlockSpec((C, HW), lambda b: (0, b)),
                 pl.BlockSpec((3, HW), lambda b: (0, b)),
                 pl.BlockSpec((C, HW), lambda b: (0, b)))
    return pl.pallas_call(kern, out_shape=outs, grid=(B,),
                          in_specs=in_specs, out_specs=out_specs,
                          compiler_params=_PAR)(*args)


def _pbmsa_call(patches, prep, *, B, Np, E):
    PPC = patches.shape[1]
    kern = partial(_pbmsa_kernel, B=B, Np=Np, E=E)
    out = jax.ShapeDtypeStruct((B * Np, PPC), jnp.float32)
    args = (patches, prep['wqkv'], prep['bqkv'], prep['seg'], prep['segt'],
            prep['wore'], prep['bore'])
    return pl.pallas_call(kern, out_shape=out, grid=(1,),
                          in_specs=[_bcast_spec(a.shape) for a in args],
                          out_specs=_bcast_spec((B * Np, PPC)),
                          compiler_params=_ARB)(*args)


def _tail_call(stats, ca, pb, prep, *, B, H, W, eps=1e-5):
    C = ca.shape[0]
    HW = H * W
    kern = partial(_tail_kernel, W_img=W, eps=eps)
    out = jax.ShapeDtypeStruct((C, B * HW), jnp.float32)
    args = (stats, ca, pb, prep['conv_masks'], prep['sa_w'],
            prep['gn2_g'], prep['gn2_b'], prep['conv_w'], prep['conv_b'],
            prep['ln_g'], prep['ln_b'])
    in_specs = ([pl.BlockSpec((3, HW), lambda b: (0, b)),
                 pl.BlockSpec((C, HW), lambda b: (0, b)),
                 pl.BlockSpec((C, HW), lambda b: (0, b))]
                + [_bcast_spec(a.shape) for a in args[3:]])
    return pl.pallas_call(kern, out_shape=out, grid=(B,),
                          in_specs=in_specs,
                          out_specs=pl.BlockSpec((C, HW), lambda b: (0, b)),
                          compiler_params=_PAR)(*args)


# ------------------------------- forward ------------------------------------

def attention_block_forward(x, prep, *, patch_size, embed_dim, num_heads,
                            gn1_groups=8):
    del num_heads  # head structure is baked into prep['seg'] / prep['segt']
    B, C, H, W = x.shape
    HW = H * W
    P = patch_size
    Hp, Wp = H // P, W // P
    Np = Hp * Wp
    PPC = P * P * C

    # channel-major slab: rows = channels, columns = b*H*W + h*W + w
    x2d = x.transpose(1, 0, 2, 3).reshape(C, B * HW)

    # kernel 1: GroupNorm(8) + spatial-attention stats + channel attention
    xn, stats, ca = _frontend_call(x2d, prep, B=B, HW=HW, G=gn1_groups)

    # TODO(synk): patch extract/restore (and the outer NCHW<->slab transposes)
    # are layout-only ~16 KB relayouts not expressible as a rectangular
    # BlockSpec; they stay as XLA copies between the three kernels.
    patches = (xn.reshape(C, B, Hp, P, Wp, P)
                 .transpose(1, 2, 4, 0, 3, 5)
                 .reshape(B * Np, PPC)
                 .astype(jnp.bfloat16))

    # kernel 2: PBMSA (patch-embed / out_proj folded into q-k-v / restore)
    rest = _pbmsa_call(patches, prep, B=B, Np=Np, E=embed_dim)

    pb = (rest.reshape(B, Hp, Wp, C, P, P)
              .transpose(3, 0, 1, 4, 2, 5)
              .reshape(C, B * HW))

    # kernel 3: SA conv+sigmoid, concat, GroupNorm(1)+GELU, 3x3 conv, LayerNorm
    out2d = _tail_call(stats, ca, pb, prep, B=B, H=H, W=W)

    return out2d.reshape(C, B, H, W).transpose(1, 0, 2, 3)


# --------------------------- parameter preparation ---------------------------

def _make_conv_masks(H, W):
    l = jnp.arange(H * W)
    hh = l // W
    ww = l % W
    rows = []
    for t in range(9):
        dh, dw = t // 3 - 1, t % 3 - 1
        rows.append((hh + dh >= 0) & (hh + dh < H) & (ww + dw >= 0) & (ww + dw < W))
    return jnp.stack(rows, axis=0).astype(jnp.float32)            # (9, H*W)


def prepare_params(params, *, C, H, W, patch_size, embed_dim, num_heads,
                   gn1_groups=8):
    """One-time host prep: fold patch-embed into q/k/v and out_proj into
    restore-embed (f32), fuse q/k/v, fold 1/sqrt(d) into q, flatten conv
    weights for stacked im2col, build masks / head-segment / group matrices,
    cast MXU-facing weights to bf16 once."""
    f32, bf16 = jnp.float32, jnp.bfloat16
    E = embed_dim
    HW = H * W
    P = patch_size
    PPC = P * P * C
    G = gn1_groups
    gs = C // G
    d = E // num_heads
    scale = 1.0 / math.sqrt(d)

    # ---- PBMSA weight folding (all in f32) ----
    w_pe = params['pe_w'].astype(f32)                  # (E, PPC) torch (out,in)
    b_pe = params['pe_b'].astype(f32)
    ipw = params['in_proj_w'].astype(f32)              # (3E, E)
    ipb = params['in_proj_b'].astype(f32)
    wq, wk, wv = ipw[:E], ipw[E:2 * E], ipw[2 * E:]
    bq, bk, bv = ipb[:E], ipb[E:2 * E], ipb[2 * E:]
    wq_f = (wq @ w_pe).T * scale                       # (PPC, E), scale folded
    wk_f = (wk @ w_pe).T
    wv_f = (wv @ w_pe).T
    bq_f = (wq @ b_pe + bq) * scale
    bk_f = wk @ b_pe + bk
    bv_f = wv @ b_pe + bv
    wqkv = jnp.concatenate([wq_f, wk_f, wv_f], axis=1).astype(bf16)   # (PPC,3E)
    bqkv = jnp.concatenate([bq_f, bk_f, bv_f]).reshape(1, 3 * E).astype(f32)

    w_op = params['out_proj_w'].astype(f32)            # (E, E)
    b_op = params['out_proj_b'].astype(f32)
    w_re = params['re_w'].astype(f32)                  # (PPC, E)
    b_re = params['re_b'].astype(f32)
    wore = (w_re @ w_op).T.astype(bf16)                # (E, PPC)
    bore = (w_re @ b_op + b_re).reshape(1, PPC).astype(f32)

    # per-head segment matrices: seg[e, h] = 1 iff column e belongs to head h
    seg = jax.nn.one_hot(jnp.arange(E) // d, num_heads, dtype=f32)    # (E, H)
    segt = seg.T                                                      # (H, E)

    # group combine matrices (only used by the kernel when gs > 1)
    emat = jax.nn.one_hot(jnp.arange(C) // gs, G, dtype=f32)          # (C, G)
    gmat = emat.T / gs                                                # (G, C)

    # 3x3 conv weights flattened for stacked im2col: index = t*Cin + cin
    conv_w = params['conv_w'].astype(f32)              # (C, 1+2C, 3, 3)
    cw = conv_w.transpose(0, 2, 3, 1).reshape(C, 9 * (1 + 2 * C)).astype(bf16)
    sa_w = params['sa_conv_w'].astype(f32)[0].reshape(3, 9)   # (cin, tap)

    return {
        'gn1_g': params['gn1_g'].reshape(C, 1).astype(f32),
        'gn1_b': params['gn1_b'].reshape(C, 1).astype(f32),
        'ca_w1': params['ca_w1'].astype(f32),          # (C//2, C)
        'ca_w2': params['ca_w2'].astype(f32),          # (C, C//2)
        'gmat': gmat, 'emat': emat,
        'wqkv': wqkv, 'bqkv': bqkv, 'seg': seg, 'segt': segt,
        'wore': wore, 'bore': bore,
        'sa_w': sa_w,
        'gn2_g': params['gn2_g'].reshape(-1, 1).astype(f32),
        'gn2_b': params['gn2_b'].reshape(-1, 1).astype(f32),
        'conv_w': cw,
        'conv_b': params['conv_b'].reshape(C, 1).astype(f32),
        'ln_g': params['ln_g'].reshape(C, HW).astype(f32),
        'ln_b': params['ln_b'].reshape(C, HW).astype(f32),
        'conv_masks': _make_conv_masks(H, W),
    }


def init_params(key, C, img, P, E, heads):
    PPC = P * P * C
    keys = jax.random.split(key, 13)

    def rnd(k, shape, scale=0.05):
        return scale * jax.random.normal(k, shape, dtype=jnp.float32)

    return {
        'gn1_g': jnp.ones((C,), jnp.float32),
        'gn1_b': jnp.zeros((C,), jnp.float32),
        'gn2_g': jnp.ones((1 + 2 * C,), jnp.float32),
        'gn2_b': jnp.zeros((1 + 2 * C,), jnp.float32),
        'ln_g': jnp.ones((C, img, img), jnp.float32),
        'ln_b': jnp.zeros((C, img, img), jnp.float32),
        'sa_conv_w': rnd(keys[0], (1, 3, 3, 3)),             # SA conv, no bias
        'ca_w1': rnd(keys[1], (C // 2, C)),                  # torch (out, in)
        'ca_w2': rnd(keys[2], (C, C // 2)),
        'pe_w': rnd(keys[3], (E, PPC)),
        'pe_b': rnd(keys[4], (E,)),
        'in_proj_w': rnd(keys[5], (3 * E, E)),
        'in_proj_b': rnd(keys[6], (3 * E,)),
        'out_proj_w': rnd(keys[7], (E, E)),
        'out_proj_b': rnd(keys[8], (E,)),
        're_w': rnd(keys[9], (PPC, E)),
        're_b': rnd(keys[10], (PPC,)),
        'conv_w': rnd(keys[11], (C, 1 + 2 * C, 3, 3)),
        'conv_b': rnd(keys[12], (C,)),
    }


if __name__ == "__main__":
    # AttentionBlock(CA_in_planes=8, img_size=16, patch_size=4, embed_dim=32,
    #                num_heads=4)
    B, C, H, W = 2, 8, 16, 16
    P, E, heads = 4, 32, 4

    key = jax.random.PRNGKey(0)
    kx, kp = jax.random.split(key)
    x = jax.random.normal(kx, (B, C, H, W), dtype=jnp.float32)
    params = init_params(kp, C, H, P, E, heads)
    prep = prepare_params(params, C=C, H=H, W=W, patch_size=P, embed_dim=E,
                          num_heads=heads, gn1_groups=8)

    fwd = jax.jit(partial(attention_block_forward,
                          patch_size=P, embed_dim=E, num_heads=heads,
                          gn1_groups=8))
    out = fwd(x, prep)
    jax.block_until_ready(out)
    assert out.shape == (B, C, H, W) and out.dtype == jnp.float32
    print("KERNEL_OK")
</pallas_src>

<mosaic_0001>
module attributes {stable_mosaic.version = 11 : i64} {
  func.func @_frontend_kernel(%arg0: i32, %arg1: memref<8x256xf32, #tpu.memory_space<vmem>>, %arg2: memref<8x1xf32, #tpu.memory_space<vmem>>, %arg3: memref<8x1xf32, #tpu.memory_space<vmem>>, %arg4: memref<4x8xf32, #tpu.memory_space<vmem>>, %arg5: memref<8x4xf32, #tpu.memory_space<vmem>>, %arg6: memref<8x8xf32, #tpu.memory_space<vmem>>, %arg7: memref<8x8xf32, #tpu.memory_space<vmem>>, %arg8: memref<8x256xf32, #tpu.memory_space<vmem>>, %arg9: memref<3x256xf32, #tpu.memory_space<vmem>>, %arg10: memref<8x256xf32, #tpu.memory_space<vmem>>) attributes {dimension_semantics = [#tpu.dimension_semantics<parallel>], iteration_bounds = array<i64: 2>, scalar_prefetch = 0 : i64, scratch_operands = 0 : i64, tpu.core_type = #tpu.core_type<tc>, window_params = [{transform_indices = @transform_0, window_bounds = array<i64: 8, 256>}, {pipeline_mode = #tpu.pipeline_mode<synchronous>, transform_indices = @transform_1, window_bounds = array<i64: 8, 1>}, {pipeline_mode = #tpu.pipeline_mode<synchronous>, transform_indices = @transform_2, window_bounds = array<i64: 8, 1>}, {pipeline_mode = #tpu.pipeline_mode<synchronous>, transform_indices = @transform_3, window_bounds = array<i64: 4, 8>}, {pipeline_mode = #tpu.pipeline_mode<synchronous>, transform_indices = @transform_4, window_bounds = array<i64: 8, 4>}, {pipeline_mode = #tpu.pipeline_mode<synchronous>, transform_indices = @transform_5, window_bounds = array<i64: 8, 8>}, {pipeline_mode = #tpu.pipeline_mode<synchronous>, transform_indices = @transform_6, window_bounds = array<i64: 8, 8>}, {transform_indices = @transform_7, window_bounds = array<i64: 8, 256>}, {transform_indices = @transform_8, window_bounds = array<i64: 3, 256>}, {transform_indices = @transform_9, window_bounds = array<i64: 8, 256>}]} {
    %c0 = arith.constant 0 : index
    %c0_0 = arith.constant 0 : index
    %0 = vector.load %arg1[%c0, %c0_0] : memref<8x256xf32, #tpu.memory_space<vmem>>, vector<8x256xf32>
    %cst = arith.constant dense<0.000000e+00> : vector<8xf32>
    %1 = vector.multi_reduction <add>, %0, %cst [1] : vector<8x256xf32> to vector<8xf32>
    %2 = vector.shape_cast %1 : vector<8xf32> to vector<8x1xf32>
    %cst_1 = arith.constant 2.560000e+02 : f32
    %3 = vector.broadcast %cst_1 : f32 to vector<8x1xf32>
    %4 = arith.divf %2, %3 : vector<8x1xf32>
    %5 = vector.broadcast %4 : vector<8x1xf32> to vector<8x256xf32>
    %6 = arith.subf %0, %5 : vector<8x256xf32>
    %7 = arith.mulf %6, %6 : vector<8x256xf32>
    %cst_2 = arith.constant dense<0.000000e+00> : vector<8xf32>
    %8 = vector.multi_reduction <add>, %7, %cst_2 [1] : vector<8x256xf32> to vector<8xf32>
    %9 = vector.shape_cast %8 : vector<8xf32> to vector<8x1xf32>
    %cst_3 = arith.constant 2.560000e+02 : f32
    %10 = vector.broadcast %cst_3 : f32 to vector<8x1xf32>
    %11 = arith.divf %9, %10 : vector<8x1xf32>
    %cst_4 = arith.constant 9.99999974E-6 : f32
    %12 = vector.broadcast %cst_4 : f32 to vector<8x1xf32>
    %13 = arith.addf %11, %12 : vector<8x1xf32>
    %14 = math.rsqrt %13 : vector<8x1xf32>
    %15 = vector.broadcast %14 : vector<8x1xf32> to vector<8x256xf32>
    %16 = arith.mulf %6, %15 : vector<8x256xf32>
    %c0_5 = arith.constant 0 : index
    %c0_6 = arith.constant 0 : index
    %17 = vector.load %arg2[%c0_5, %c0_6] : memref<8x1xf32, #tpu.memory_space<vmem>>, vector<8x1xf32>
    %18 = vector.broadcast %17 : vector<8x1xf32> to vector<8x256xf32>
    %19 = arith.mulf %16, %18 : vector<8x256xf32>
    %c0_7 = arith.constant 0 : index
    %c0_8 = arith.constant 0 : index
    %20 = vector.load %arg3[%c0_7, %c0_8] : memref<8x1xf32, #tpu.memory_space<vmem>>, vector<8x1xf32>
    %21 = vector.broadcast %20 : vector<8x1xf32> to vector<8x256xf32>
    %22 = arith.addf %19, %21 : vector<8x256xf32>
    %c0_9 = arith.constant 0 : index
    %c0_10 = arith.constant 0 : index
    %23 = vector.load %arg8[%c0_9, %c0_10] : memref<8x256xf32, #tpu.memory_space<vmem>>, vector<8x256xf32>
    tpu.vector_store %arg8[%c0_9, %c0_10], %22 {strides = array<i32>} : memref<8x256xf32, #tpu.memory_space<vmem>>, vector<8x256xf32>,
    %cst_11 = arith.constant dense<0x7F800000> : vector<256xf32>
    %24 = vector.multi_reduction <minimumf>, %22, %cst_11 [0] : vector<8x256xf32> to vector<256xf32>
    %25 = vector.shape_cast %24 : vector<256xf32> to vector<1x256xf32>
    %cst_12 = arith.constant dense<0.000000e+00> : vector<256xf32>
    %26 = vector.multi_reduction <add>, %22, %cst_12 [0] : vector<8x256xf32> to vector<256xf32>
    %27 = vector.shape_cast %26 : vector<256xf32> to vector<1x256xf32>
    %cst_13 = arith.constant 8.000000e+00 : f32
    %28 = vector.broadcast %cst_13 : f32 to vector<1x256xf32>
    %29 = arith.divf %27, %28 : vector<1x256xf32>
    %cst_14 = arith.constant dense<0xFF800000> : vector<256xf32>
    %30 = vector.multi_reduction <maximumf>, %22, %cst_14 [0] : vector<8x256xf32> to vector<256xf32>
    %31 = vector.shape_cast %30 : vector<256xf32> to vector<1x256xf32>
    %32 = tpu.concatenate %25, %29, %31 in 0 : vector<1x256xf32>, vector<1x256xf32>, vector<1x256xf32> -> vector<3x256xf32>
    %c0_15 = arith.constant 0 : index
    %c0_16 = arith.constant 0 : index
    %33 = vector.load %arg9[%c0_15, %c0_16] : memref<3x256xf32, #tpu.memory_space<vmem>>, vector<3x256xf32>
    tpu.vector_store %arg9[%c0_15, %c0_16], %32 {strides = array<i32>} : memref<3x256xf32, #tpu.memory_space<vmem>>, vector<3x256xf32>,
    %cst_17 = arith.constant dense<0.000000e+00> : vector<8xf32>
    %34 = vector.multi_reduction <add>, %22, %cst_17 [1] : vector<8x256xf32> to vector<8xf32>
    %35 = vector.shape_cast %34 : vector<8xf32> to vector<8x1xf32>
    %cst_18 = arith.constant 2.560000e+02 : f32
    %36 = vector.broadcast %cst_18 : f32 to vector<8x1xf32>
    %37 = arith.divf %35, %36 : vector<8x1xf32>
    %c0_19 = arith.constant 0 : index
    %c0_20 = arith.constant 0 : index
    %38 = vector.load %arg4[%c0_19, %c0_20] : memref<4x8xf32, #tpu.memory_space<vmem>>, vector<4x8xf32>
    %cst_21 = arith.constant dense<0.000000e+00> : vector<4x1xf32>
    %39 = tpu.matmul %38, %37, %cst_21 {dimension_numbers = #tpu.dot_dimension_numbers<[1], [0], [0], [1], [0, 0, 1, 1], [], []>} : vector<4x8xf32>, vector<8x1xf32>, vector<4x1xf32> -> vector<4x1xf32>
    %cst_22 = arith.constant 0.000000e+00 : f32
    %40 = vector.broadcast %cst_22 : f32 to vector<4x1xf32>
    %41 = arith.maximumf %39, %40 : vector<4x1xf32>
    %c0_23 = arith.constant 0 : index
    %c0_24 = arith.constant 0 : index
    %42 = vector.load %arg5[%c0_23, %c0_24] : memref<8x4xf32, #tpu.memory_space<vmem>>, vector<8x4xf32>
    %cst_25 = arith.constant dense<0.000000e+00> : vector<8x1xf32>
    %43 = tpu.matmul %42, %41, %cst_25 {dimension_numbers = #tpu.dot_dimension_numbers<[1], [0], [0], [1], [0, 0, 1, 1], [], []>} : vector<8x4xf32>, vector<4x1xf32>, vector<8x1xf32> -> vector<8x1xf32>
    %44 = arith.negf %43 : vector<8x1xf32>
    %45 = math.exp %44 : vector<8x1xf32>
    %cst_26 = arith.constant 1.000000e+00 : f32
    %46 = vector.broadcast %cst_26 : f32 to vector<8x1xf32>
    %47 = arith.addf %46, %45 : vector<8x1xf32>
    %48 = arith.divf %46, %47 : vector<8x1xf32>
    %49 = vector.broadcast %48 : vector<8x1xf32> to vector<8x256xf32>
    %50 = arith.mulf %22, %49 : vector<8x256xf32>
    %c0_27 = arith.constant 0 : index
    %c0_28 = arith.constant 0 : index
    %51 = vector.load %arg10[%c0_27, %c0_28] : memref<8x256xf32, #tpu.memory_space<vmem>>, vector<8x256xf32>
    tpu.vector_store %arg10[%c0_27, %c0_28], %50 {strides = array<i32>} : memref<8x256xf32, #tpu.memory_space<vmem>>, vector<8x256xf32>,
    return
  }
  func.func @transform_0(%arg0: i32) -> (i32, i32) {
    %c0_i32 = arith.constant 0 : i32
    %c0_i32_0 = arith.constant 0 : i32
    return %c0_i32, %arg0 : i32, i32
  }
  func.func @transform_1(%arg0: i32) -> (i32, i32) {
    %c0_i32 = arith.constant 0 : i32
    %c0_i32_0 = arith.constant 0 : i32
    %c0_i32_1 = arith.constant 0 : i32
    return %c0_i32, %c0_i32_0 : i32, i32
  }
  func.func @transform_2(%arg0: i32) -> (i32, i32) {
    %c0_i32 = arith.constant 0 : i32
    %c0_i32_0 = arith.constant 0 : i32
    %c0_i32_1 = arith.constant 0 : i32
    return %c0_i32, %c0_i32_0 : i32, i32
  }
  func.func @transform_3(%arg0: i32) -> (i32, i32) {
    %c0_i32 = arith.constant 0 : i32
    %c0_i32_0 = arith.constant 0 : i32
    %c0_i32_1 = arith.constant 0 : i32
    return %c0_i32, %c0_i32_0 : i32, i32
  }
  func.func @transform_4(%arg0: i32) -> (i32, i32) {
    %c0_i32 = arith.constant 0 : i32
    %c0_i32_0 = arith.constant 0 : i32
    %c0_i32_1 = arith.constant 0 : i32
    return %c0_i32, %c0_i32_0 : i32, i32
  }
  func.func @transform_5(%arg0: i32) -> (i32, i32) {
    %c0_i32 = arith.constant 0 : i32
    %c0_i32_0 = arith.constant 0 : i32
    %c0_i32_1 = arith.constant 0 : i32
    return %c0_i32, %c0_i32_0 : i32, i32
  }
  func.func @transform_6(%arg0: i32) -> (i32, i32) {
    %c0_i32 = arith.constant 0 : i32
    %c0_i32_0 = arith.constant 0 : i32
    %c0_i32_1 = arith.constant 0 : i32
    return %c0_i32, %c0_i32_0 : i32, i32
  }
  func.func @transform_7(%arg0: i32) -> (i32, i32) {
    %c0_i32 = arith.constant 0 : i32
    %c0_i32_0 = arith.constant 0 : i32
    return %c0_i32, %arg0 : i32, i32
  }
  func.func @transform_8(%arg0: i32) -> (i32, i32) {
    %c0_i32 = arith.constant 0 : i32
    %c0_i32_0 = arith.constant 0 : i32
    return %c0_i32, %arg0 : i32, i32
  }
  func.func @transform_9(%arg0: i32) -> (i32, i32) {
    %c0_i32 = arith.constant 0 : i32
    %c0_i32_0 = arith.constant 0 : i32
    return %c0_i32, %arg0 : i32, i32
  }
}

module attributes {stable_mosaic.version = 11 : i64} {
  func.func @_pbmsa_kernel(%arg0: i32, %arg1: memref<32x128xbf16, #tpu.memory_space<vmem>>, %arg2: memref<128x96xbf16, #tpu.memory_space<vmem>>, %arg3: memref<1x96xf32, #tpu.memory_space<vmem>>, %arg4: memref<32x4xf32, #tpu.memory_space<vmem>>, %arg5: memref<4x32xf32, #tpu.memory_space<vmem>>, %arg6: memref<32x128xbf16, #tpu.memory_space<vmem>>, %arg7: memref<1x128xf32, #tpu.memory_space<vmem>>, %arg8: memref<32x128xf32, #tpu.memory_space<vmem>>) attributes {dimension_semantics = [#tpu.dimension_semantics<arbitrary>], iteration_bounds = array<i64: 1>, scalar_prefetch = 0 : i64, scratch_operands = 0 : i64, tpu.core_type = #tpu.core_type<tc>, window_params = [{pipeline_mode = #tpu.pipeline_mode<synchronous>, transform_indices = @transform_0, window_bounds = array<i64: 32, 128>}, {pipeline_mode = #tpu.pipeline_mode<synchronous>, transform_indices = @transform_1, window_bounds = array<i64: 128, 96>}, {pipeline_mode = #tpu.pipeline_mode<synchronous>, transform_indices = @transform_2, window_bounds = array<i64: 1, 96>}, {pipeline_mode = #tpu.pipeline_mode<synchronous>, transform_indices = @transform_3, window_bounds = array<i64: 32, 4>}, {pipeline_mode = #tpu.pipeline_mode<synchronous>, transform_indices = @transform_4, window_bounds = array<i64: 4, 32>}, {pipeline_mode = #tpu.pipeline_mode<synchronous>, transform_indices = @transform_5, window_bounds = array<i64: 32, 128>}, {pipeline_mode = #tpu.pipeline_mode<synchronous>, transform_indices = @transform_6, window_bounds = array<i64: 1, 128>}, {pipeline_mode = #tpu.pipeline_mode<synchronous>, transform_indices = @transform_7, window_bounds = array<i64: 32, 128>}]} {
    %c0 = arith.constant 0 : index
    %c0_0 = arith.constant 0 : index
    %0 = vector.load %arg1[%c0, %c0_0] : memref<32x128xbf16, #tpu.memory_space<vmem>>, vector<32x128xbf16>
    %c0_1 = arith.constant 0 : index
    %c0_2 = arith.constant 0 : index
    %1 = vector.load %arg2[%c0_1, %c0_2] : memref<128x96xbf16, #tpu.memory_space<vmem>>, vector<128x96xbf16>
    %cst = arith.constant dense<0.000000e+00> : vector<32x96xf32>
    %2 = tpu.matmul %0, %1, %cst {dimension_numbers = #tpu.dot_dimension_numbers<[1], [0], [0], [1], [0, 0, 1, 1], [], []>} : vector<32x128xbf16>, vector<128x96xbf16>, vector<32x96xf32> -> vector<32x96xf32>
    %c0_3 = arith.constant 0 : index
    %c0_4 = arith.constant 0 : index
    %3 = vector.load %arg3[%c0_3, %c0_4] : memref<1x96xf32, #tpu.memory_space<vmem>>, vector<1x96xf32>
    %4 = vector.broadcast %3 : vector<1x96xf32> to vector<32x96xf32>
    %5 = arith.addf %2, %4 : vector<32x96xf32>
    %6 = vector.extract_strided_slice %5 {offsets = [0, 0], sizes = [32, 32], strides = [1, 1]} : vector<32x96xf32> to vector<32x32xf32>
    %7 = vector.extract_strided_slice %5 {offsets = [0, 32], sizes = [32, 32], strides = [1, 1]} : vector<32x96xf32> to vector<32x32xf32>
    %8 = vector.extract_strided_slice %5 {offsets = [0, 64], sizes = [32, 32], strides = [1, 1]} : vector<32x96xf32> to vector<32x32xf32>
    %c0_5 = arith.constant 0 : index
    %c0_6 = arith.constant 0 : index
    %9 = vector.load %arg4[%c0_5, %c0_6] : memref<32x4xf32, #tpu.memory_space<vmem>>, vector<32x4xf32>
    %c0_7 = arith.constant 0 : index
    %c0_8 = arith.constant 0 : index
    %10 = vector.load %arg5[%c0_7, %c0_8] : memref<4x32xf32, #tpu.memory_space<vmem>>, vector<4x32xf32>
    %11 = vector.extract_strided_slice %6 {offsets = [0, 0], sizes = [16, 32], strides = [1, 1]} : vector<32x32xf32> to vector<16x32xf32>
    %12 = vector.extract_strided_slice %7 {offsets = [0, 0], sizes = [16, 32], strides = [1, 1]} : vector<32x32xf32> to vector<16x32xf32>
    %13 = arith.mulf %11, %12 : vector<16x32xf32>
    %14 = vector.extract_strided_slice %7 {offsets = [16, 0], sizes = [16, 32], strides = [1, 1]} : vector<32x32xf32> to vector<16x32xf32>
    %15 = arith.mulf %11, %14 : vector<16x32xf32>
    %16 = vector.extract_strided_slice %6 {offsets = [16, 0], sizes = [16, 32], strides = [1, 1]} : vector<32x32xf32> to vector<16x32xf32>
    %17 = vector.extract_strided_slice %7 {offsets = [0, 0], sizes = [16, 32], strides = [1, 1]} : vector<32x32xf32> to vector<16x32xf32>
    %18 = arith.mulf %16, %17 : vector<16x32xf32>
    %19 = vector.extract_strided_slice %7 {offsets = [16, 0], sizes = [16, 32], strides = [1, 1]} : vector<32x32xf32> to vector<16x32xf32>
    %20 = arith.mulf %16, %19 : vector<16x32xf32>
    %21 = tpu.concatenate %13, %15, %18, %20 in 0 : vector<16x32xf32>, vector<16x32xf32>, vector<16x32xf32>, vector<16x32xf32> -> vector<64x32xf32>
    %cst_9 = arith.constant dense<0.000000e+00> : vector<64x4xf32>
    %22 = tpu.matmul %21, %9, %cst_9 {dimension_numbers = #tpu.dot_dimension_numbers<[1], [0], [0], [1], [0, 0, 1, 1], [], []>} : vector<64x32xf32>, vector<32x4xf32>, vector<64x4xf32> -> vector<64x4xf32>
    %23 = vector.extract_strided_slice %22 {offsets = [0, 0], sizes = [16, 4], strides = [1, 1]} : vector<64x4xf32> to vector<16x4xf32>
    %24 = vector.extract_strided_slice %22 {offsets = [16, 0], sizes = [16, 4], strides = [1, 1]} : vector<64x4xf32> to vector<16x4xf32>
    %25 = arith.maximumf %23, %24 : vector<16x4xf32>
    %26 = arith.subf %23, %25 : vector<16x4xf32>
    %27 = math.exp %26 : vector<16x4xf32>
    %28 = arith.subf %24, %25 : vector<16x4xf32>
    %29 = math.exp %28 : vector<16x4xf32>
    %30 = arith.addf %27, %29 : vector<16x4xf32>
    %31 = tpu.reciprocal %30 {approx = true} : vector<16x4xf32> -> vector<16x4xf32>
    %32 = arith.mulf %27, %31 : vector<16x4xf32>
    %33 = arith.mulf %29, %31 : vector<16x4xf32>
    %34 = vector.extract_strided_slice %22 {offsets = [32, 0], sizes = [16, 4], strides = [1, 1]} : vector<64x4xf32> to vector<16x4xf32>
    %35 = vector.extract_strided_slice %22 {offsets = [48, 0], sizes = [16, 4], strides = [1, 1]} : vector<64x4xf32> to vector<16x4xf32>
    %36 = arith.maximumf %34, %35 : vector<16x4xf32>
    %37 = arith.subf %34, %36 : vector<16x4xf32>
    %38 = math.exp %37 : vector<16x4xf32>
    %39 = arith.subf %35, %36 : vector<16x4xf32>
    %40 = math.exp %39 : vector<16x4xf32>
    %41 = arith.addf %38, %40 : vector<16x4xf32>
    %42 = tpu.reciprocal %41 {approx = true} : vector<16x4xf32> -> vector<16x4xf32>
    %43 = arith.mulf %38, %42 : vector<16x4xf32>
    %44 = arith.mulf %40, %42 : vector<16x4xf32>
    %45 = tpu.concatenate %32, %33, %43, %44 in 0 : vector<16x4xf32>, vector<16x4xf32>, vector<16x4xf32>, vector<16x4xf32> -> vector<64x4xf32>
    %cst_10 = arith.constant dense<0.000000e+00> : vector<64x32xf32>
    %46 = tpu.matmul %45, %10, %cst_10 {dimension_numbers = #tpu.dot_dimension_numbers<[1], [0], [0], [1], [0, 0, 1, 1], [], []>} : vector<64x4xf32>, vector<4x32xf32>, vector<64x32xf32> -> vector<64x32xf32>
    %47 = vector.extract_strided_slice %46 {offsets = [0, 0], sizes = [16, 32], strides = [1, 1]} : vector<64x32xf32> to vector<16x32xf32>
    %48 = vector.extract_strided_slice %8 {offsets = [0, 0], sizes = [16, 32], strides = [1, 1]} : vector<32x32xf32> to vector<16x32xf32>
    %49 = arith.mulf %47, %48 : vector<16x32xf32>
    %50 = vector.extract_strided_slice %46 {offsets = [16, 0], sizes = [16, 32], strides = [1, 1]} : vector<64x32xf32> to vector<16x32xf32>
    %51 = vector.extract_strided_slice %8 {offsets = [16, 0], sizes = [16, 32], strides = [1, 1]} : vector<32x32xf32> to vector<16x32xf32>
    %52 = arith.mulf %50, %51 : vector<16x32xf32>
    %53 = arith.addf %49, %52 : vector<16x32xf32>
    %54 = vector.extract_strided_slice %46 {offsets = [32, 0], sizes = [16, 32], strides = [1, 1]} : vector<64x32xf32> to vector<16x32xf32>
    %55 = vector.extract_strided_slice %8 {offsets = [0, 0], sizes = [16, 32], strides = [1, 1]} : vector<32x32xf32> to vector<16x32xf32>
    %56 = arith.mulf %54, %55 : vector<16x32xf32>
    %57 = vector.extract_strided_slice %46 {offsets = [48, 0], sizes = [16, 32], strides = [1, 1]} : vector<64x32xf32> to vector<16x32xf32>
    %58 = vector.extract_strided_slice %8 {offsets = [16, 0], sizes = [16, 32], strides = [1, 1]} : vector<32x32xf32> to vector<16x32xf32>
    %59 = arith.mulf %57, %58 : vector<16x32xf32>
    %60 = arith.addf %56, %59 : vector<16x32xf32>
    %61 = tpu.concatenate %53, %60 in 0 : vector<16x32xf32>, vector<16x32xf32> -> vector<32x32xf32>
    %62 = arith.truncf %61 : vector<32x32xf32> to vector<32x32xbf16>
    %c0_11 = arith.constant 0 : index
    %c0_12 = arith.constant 0 : index
    %63 = vector.load %arg6[%c0_11, %c0_12] : memref<32x128xbf16, #tpu.memory_space<vmem>>, vector<32x128xbf16>
    %cst_13 = arith.constant dense<0.000000e+00> : vector<32x128xf32>
    %64 = tpu.matmul %62, %63, %cst_13 {dimension_numbers = #tpu.dot_dimension_numbers<[1], [0], [0], [1], [0, 0, 1, 1], [], []>} : vector<32x32xbf16>, vector<32x128xbf16>, vector<32x128xf32> -> vector<32x128xf32>
    %c0_14 = arith.constant 0 : index
    %c0_15 = arith.constant 0 : index
    %65 = vector.load %arg7[%c0_14, %c0_15] : memref<1x128xf32, #tpu.memory_space<vmem>>, vector<1x128xf32>
    %66 = vector.broadcast %65 : vector<1x128xf32> to vector<32x128xf32>
    %67 = arith.addf %64, %66 : vector<32x128xf32>
    %c0_16 = arith.constant 0 : index
    %c0_17 = arith.constant 0 : index
    %68 = vector.load %arg8[%c0_16, %c0_17] : memref<32x128xf32, #tpu.memory_space<vmem>>, vector<32x128xf32>
    tpu.vector_store %arg8[%c0_16, %c0_17], %67 {strides = array<i32>} : memref<32x128xf32, #tpu.memory_space<vmem>>, vector<32x128xf32>,
    return
  }
  func.func @transform_0(%arg0: i32) -> (i32, i32) {
    %c0_i32 = arith.constant 0 : i32
    %c0_i32_0 = arith.constant 0 : i32
    %c0_i32_1 = arith.constant 0 : i32
    return %c0_i32, %c0_i32_0 : i32, i32
  }
  func.func @transform_1(%arg0: i32) -> (i32, i32) {
    %c0_i32 = arith.constant 0 : i32
    %c0_i32_0 = arith.constant 0 : i32
    %c0_i32_1 = arith.constant 0 : i32
    return %c0_i32, %c0_i32_0 : i32, i32
  }
  func.func @transform_2(%arg0: i32) -> (i32, i32) {
    %c0_i32 = arith.constant 0 : i32
    %c0_i32_0 = arith.constant 0 : i32
    %c0_i32_1 = arith.constant 0 : i32
    return %c0_i32, %c0_i32_0 : i32, i32
  }
  func.func @transform_3(%arg0: i32) -> (i32, i32) {
    %c0_i32 = arith.constant 0 : i32
    %c0_i32_0 = arith.constant 0 : i32
    %c0_i32_1 = arith.constant 0 : i32
    return %c0_i32, %c0_i32_0 : i32, i32
  }
  func.func @transform_4(%arg0: i32) -> (i32, i32) {
    %c0_i32 = arith.constant 0 : i32
    %c0_i32_0 = arith.constant 0 : i32
    %c0_i32_1 = arith.constant 0 : i32
    return %c0_i32, %c0_i32_0 : i32, i32
  }
  func.func @transform_5(%arg0: i32) -> (i32, i32) {
    %c0_i32 = arith.constant 0 : i32
    %c0_i32_0 = arith.constant 0 : i32
    %c0_i32_1 = arith.constant 0 : i32
    return %c0_i32, %c0_i32_0 : i32, i32
  }
  func.func @transform_6(%arg0: i32) -> (i32, i32) {
    %c0_i32 = arith.constant 0 : i32
    %c0_i32_0 = arith.constant 0 : i32
    %c0_i32_1 = arith.constant 0 : i32
    return %c0_i32, %c0_i32_0 : i32, i32
  }
  func.func @transform_7(%arg0: i32) -> (i32, i32) {
    %c0_i32 = arith.constant 0 : i32
    %c0_i32_0 = arith.constant 0 : i32
    %c0_i32_1 = arith.constant 0 : i32
    return %c0_i32, %c0_i32_0 : i32, i32
  }
}

module attributes {stable_mosaic.version = 11 : i64} {
  func.func @_tail_kernel(%arg0: i32, %arg1: memref<3x256xf32, #tpu.memory_space<vmem>>, %arg2: memref<8x256xf32, #tpu.memory_space<vmem>>, %arg3: memref<8x256xf32, #tpu.memory_space<vmem>>, %arg4: memref<9x256xf32, #tpu.memory_space<vmem>>, %arg5: memref<3x9xf32, #tpu.memory_space<vmem>>, %arg6: memref<17x1xf32, #tpu.memory_space<vmem>>, %arg7: memref<17x1xf32, #tpu.memory_space<vmem>>, %arg8: memref<8x153xbf16, #tpu.memory_space<vmem>>, %arg9: memref<8x1xf32, #tpu.memory_space<vmem>>, %arg10: memref<8x256xf32, #tpu.memory_space<vmem>>, %arg11: memref<8x256xf32, #tpu.memory_space<vmem>>, %arg12: memref<8x256xf32, #tpu.memory_space<vmem>>) attributes {dimension_semantics = [#tpu.dimension_semantics<parallel>], iteration_bounds = array<i64: 2>, scalar_prefetch = 0 : i64, scratch_operands = 0 : i64, tpu.core_type = #tpu.core_type<tc>, window_params = [{transform_indices = @transform_0, window_bounds = array<i64: 3, 256>}, {transform_indices = @transform_1, window_bounds = array<i64: 8, 256>}, {transform_indices = @transform_2, window_bounds = array<i64: 8, 256>}, {pipeline_mode = #tpu.pipeline_mode<synchronous>, transform_indices = @transform_3, window_bounds = array<i64: 9, 256>}, {pipeline_mode = #tpu.pipeline_mode<synchronous>, transform_indices = @transform_4, window_bounds = array<i64: 3, 9>}, {pipeline_mode = #tpu.pipeline_mode<synchronous>, transform_indices = @transform_5, window_bounds = array<i64: 17, 1>}, {pipeline_mode = #tpu.pipeline_mode<synchronous>, transform_indices = @transform_6, window_bounds = array<i64: 17, 1>}, {pipeline_mode = #tpu.pipeline_mode<synchronous>, transform_indices = @transform_7, window_bounds = array<i64: 8, 153>}, {pipeline_mode = #tpu.pipeline_mode<synchronous>, transform_indices = @transform_8, window_bounds = array<i64: 8, 1>}, {pipeline_mode = #tpu.pipeline_mode<synchronous>, transform_indices = @transform_9, window_bounds = array<i64: 8, 256>}, {pipeline_mode = #tpu.pipeline_mode<synchronous>, transform_indices = @transform_10, window_bounds = array<i64: 8, 256>}, {transform_indices = @transform_11, window_bounds = array<i64: 8, 256>}]} {
    %c0 = arith.constant 0 : index
    %c0_0 = arith.constant 0 : index
    %0 = vector.load %arg1[%c0, %c0_0] : memref<3x256xf32, #tpu.memory_space<vmem>>, vector<3x256xf32>
    %c0_1 = arith.constant 0 : index
    %c0_2 = arith.constant 0 : index
    %1 = vector.load %arg4[%c0_1, %c0_2] : memref<9x256xf32, #tpu.memory_space<vmem>>, vector<9x256xf32>
    %c0_3 = arith.constant 0 : index
    %c0_4 = arith.constant 0 : index
    %2 = vector.load %arg5[%c0_3, %c0_4] : memref<3x9xf32, #tpu.memory_space<vmem>>, vector<3x9xf32>
    %c17_i32 = arith.constant 17 : i32
    %3 = tpu.dynamic_rotate %0 by %c17_i32 dim 1 : vector<3x256xf32>, i32 -> vector<3x256xf32>
    %4 = vector.extract_strided_slice %1 {offsets = [0, 0], sizes = [1, 256], strides = [1, 1]} : vector<9x256xf32> to vector<1x256xf32>
    %5 = vector.broadcast %4 : vector<1x256xf32> to vector<3x256xf32>
    %6 = arith.mulf %3, %5 : vector<3x256xf32>
    %c16_i32 = arith.constant 16 : i32
    %7 = tpu.dynamic_rotate %0 by %c16_i32 dim 1 : vector<3x256xf32>, i32 -> vector<3x256xf32>
    %8 = vector.extract_strided_slice %1 {offsets = [1, 0], sizes = [1, 256], strides = [1, 1]} : vector<9x256xf32> to vector<1x256xf32>
    %9 = vector.broadcast %8 : vector<1x256xf32> to vector<3x256xf32>
    %10 = arith.mulf %7, %9 : vector<3x256xf32>
    %c15_i32 = arith.constant 15 : i32
    %11 = tpu.dynamic_rotate %0 by %c15_i32 dim 1 : vector<3x256xf32>, i32 -> vector<3x256xf32>
    %12 = vector.extract_strided_slice %1 {offsets = [2, 0], sizes = [1, 256], strides = [1, 1]} : vector<9x256xf32> to vector<1x256xf32>
    %13 = vector.broadcast %12 : vector<1x256xf32> to vector<3x256xf32>
    %14 = arith.mulf %11, %13 : vector<3x256xf32>
    %c1_i32 = arith.constant 1 : i32
    %15 = tpu.dynamic_rotate %0 by %c1_i32 dim 1 : vector<3x256xf32>, i32 -> vector<3x256xf32>
    %16 = vector.extract_strided_slice %1 {offsets = [3, 0], sizes = [1, 256], strides = [1, 1]} : vector<9x256xf32> to vector<1x256xf32>
    %17 = vector.broadcast %16 : vector<1x256xf32> to vector<3x256xf32>
    %18 = arith.mulf %15, %17 : vector<3x256xf32>
    %19 = vector.extract_strided_slice %1 {offsets = [4, 0], sizes = [1, 256], strides = [1, 1]} : vector<9x256xf32> to vector<1x256xf32>
    %20 = vector.broadcast %19 : vector<1x256xf32> to vector<3x256xf32>
    %21 = arith.mulf %0, %20 : vector<3x256xf32>
    %c255_i32 = arith.constant 255 : i32
    %22 = tpu.dynamic_rotate %0 by %c255_i32 dim 1 : vector<3x256xf32>, i32 -> vector<3x256xf32>
    %23 = vector.extract_strided_slice %1 {offsets = [5, 0], sizes = [1, 256], strides = [1, 1]} : vector<9x256xf32> to vector<1x256xf32>
    %24 = vector.broadcast %23 : vector<1x256xf32> to vector<3x256xf32>
    %25 = arith.mulf %22, %24 : vector<3x256xf32>
    %c241_i32 = arith.constant 241 : i32
    %26 = tpu.dynamic_rotate %0 by %c241_i32 dim 1 : vector<3x256xf32>, i32 -> vector<3x256xf32>
    %27 = vector.extract_strided_slice %1 {offsets = [6, 0], sizes = [1, 256], strides = [1, 1]} : vector<9x256xf32> to vector<1x256xf32>
    %28 = vector.broadcast %27 : vector<1x256xf32> to vector<3x256xf32>
    %29 = arith.mulf %26, %28 : vector<3x256xf32>
    %c240_i32 = arith.constant 240 : i32
    %30 = tpu.dynamic_rotate %0 by %c240_i32 dim 1 : vector<3x256xf32>, i32 -> vector<3x256xf32>
    %31 = vector.extract_strided_slice %1 {offsets = [7, 0], sizes = [1, 256], strides = [1, 1]} : vector<9x256xf32> to vector<1x256xf32>
    %32 = vector.broadcast %31 : vector<1x256xf32> to vector<3x256xf32>
    %33 = arith.mulf %30, %32 : vector<3x256xf32>
    %c239_i32 = arith.constant 239 : i32
    %34 = tpu.dynamic_rotate %0 by %c239_i32 dim 1 : vector<3x256xf32>, i32 -> vector<3x256xf32>
    %35 = vector.extract_strided_slice %1 {offsets = [8, 0], sizes = [1, 256], strides = [1, 1]} : vector<9x256xf32> to vector<1x256xf32>
    %36 = vector.broadcast %35 : vector<1x256xf32> to vector<3x256xf32>
    %37 = arith.mulf %34, %36 : vector<3x256xf32>
    %38 = vector.extract_strided_slice %2 {offsets = [0, 0], sizes = [3, 1], strides = [1, 1]} : vector<3x9xf32> to vector<3x1xf32>
    %39 = vector.broadcast %38 : vector<3x1xf32> to vector<3x256xf32>
    %40 = arith.mulf %39, %6 : vector<3x256xf32>
    %41 = vector.extract_strided_slice %2 {offsets = [0, 1], sizes = [3, 1], strides = [1, 1]} : vector<3x9xf32> to vector<3x1xf32>
    %42 = vector.broadcast %41 : vector<3x1xf32> to vector<3x256xf32>
    %43 = arith.mulf %42, %10 : vector<3x256xf32>
    %44 = arith.addf %40, %43 : vector<3x256xf32>
    %45 = vector.extract_strided_slice %2 {offsets = [0, 2], sizes = [3, 1], strides = [1, 1]} : vector<3x9xf32> to vector<3x1xf32>
    %46 = vector.broadcast %45 : vector<3x1xf32> to vector<3x256xf32>
    %47 = arith.mulf %46, %14 : vector<3x256xf32>
    %48 = arith.addf %44, %47 : vector<3x256xf32>
    %49 = vector.extract_strided_slice %2 {offsets = [0, 3], sizes = [3, 1], strides = [1, 1]} : vector<3x9xf32> to vector<3x1xf32>
    %50 = vector.broadcast %49 : vector<3x1xf32> to vector<3x256xf32>
    %51 = arith.mulf %50, %18 : vector<3x256xf32>
    %52 = arith.addf %48, %51 : vector<3x256xf32>
    %53 = vector.extract_strided_slice %2 {offsets = [0, 4], sizes = [3, 1], strides = [1, 1]} : vector<3x9xf32> to vector<3x1xf32>
    %54 = vector.broadcast %53 : vector<3x1xf32> to vector<3x256xf32>
    %55 = arith.mulf %54, %21 : vector<3x256xf32>
    %56 = arith.addf %52, %55 : vector<3x256xf32>
    %57 = vector.extract_strided_slice %2 {offsets = [0, 5], sizes = [3, 1], strides = [1, 1]} : vector<3x9xf32> to vector<3x1xf32>
    %58 = vector.broadcast %57 : vector<3x1xf32> to vector<3x256xf32>
    %59 = arith.mulf %58, %25 : vector<3x256xf32>
    %60 = arith.addf %56, %59 : vector<3x256xf32>
    %61 = vector.extract_strided_slice %2 {offsets = [0, 6], sizes = [3, 1], strides = [1, 1]} : vector<3x9xf32> to vector<3x1xf32>
    %62 = vector.broadcast %61 : vector<3x1xf32> to vector<3x256xf32>
    %63 = arith.mulf %62, %29 : vector<3x256xf32>
    %64 = arith.addf %60, %63 : vector<3x256xf32>
    %65 = vector.extract_strided_slice %2 {offsets = [0, 7], sizes = [3, 1], strides = [1, 1]} : vector<3x9xf32> to vector<3x1xf32>
    %66 = vector.broadcast %65 : vector<3x1xf32> to vector<3x256xf32>
    %67 = arith.mulf %66, %33 : vector<3x256xf32>
    %68 = arith.addf %64, %67 : vector<3x256xf32>
    %69 = vector.extract_strided_slice %2 {offsets = [0, 8], sizes = [3, 1], strides = [1, 1]} : vector<3x9xf32> to vector<3x1xf32>
    %70 = vector.broadcast %69 : vector<3x1xf32> to vector<3x256xf32>
    %71 = arith.mulf %70, %37 : vector<3x256xf32>
    %72 = arith.addf %68, %71 : vector<3x256xf32>
    %cst = arith.constant dense<0.000000e+00> : vector<256xf32>
    %73 = vector.multi_reduction <add>, %72, %cst [0] : vector<3x256xf32> to vector<256xf32>
    %74 = vector.shape_cast %73 : vector<256xf32> to vector<1x256xf32>
    %75 = arith.negf %74 : vector<1x256xf32>
    %76 = math.exp %75 : vector<1x256xf32>
    %cst_5 = arith.constant 1.000000e+00 : f32
    %77 = vector.broadcast %cst_5 : f32 to vector<1x256xf32>
    %78 = arith.addf %77, %76 : vector<1x256xf32>
    %79 = arith.divf %77, %78 : vector<1x256xf32>
    %c0_6 = arith.constant 0 : index
    %c0_7 = arith.constant 0 : index
    %80 = vector.load %arg2[%c0_6, %c0_7] : memref<8x256xf32, #tpu.memory_space<vmem>>, vector<8x256xf32>
    %c0_8 = arith.constant 0 : index
    %c0_9 = arith.constant 0 : index
    %81 = vector.load %arg3[%c0_8, %c0_9] : memref<8x256xf32, #tpu.memory_space<vmem>>, vector<8x256xf32>
    %82 = tpu.concatenate %79, %80, %81 in 0 : vector<1x256xf32>, vector<8x256xf32>, vector<8x256xf32> -> vector<17x256xf32>
    %cst_10 = arith.constant dense<0.000000e+00> : vector<17xf32>
    %83 = vector.multi_reduction <add>, %82, %cst_10 [1] : vector<17x256xf32> to vector<17xf32>
    %84 = vector.shape_cast %83 : vector<17xf32> to vector<17x1xf32>
    %cst_11 = arith.constant 2.560000e+02 : f32
    %85 = vector.broadcast %cst_11 : f32 to vector<17x1xf32>
    %86 = arith.divf %84, %85 : vector<17x1xf32>
    %cst_12 = arith.constant dense<0.000000e+00> : vector<1xf32>
    %87 = vector.multi_reduction <add>, %86, %cst_12 [0] : vector<17x1xf32> to vector<1xf32>
    %88 = vector.shape_cast %87 : vector<1xf32> to vector<1x1xf32>
    %cst_13 = arith.constant 1.700000e+01 : f32
    %89 = vector.broadcast %cst_13 : f32 to vector<1x1xf32>
    %90 = arith.divf %88, %89 : vector<1x1xf32>
    %91 = vector.broadcast %90 : vector<1x1xf32> to vector<17x256xf32>
    %92 = arith.subf %82, %91 : vector<17x256xf32>
    %93 = arith.mulf %92, %92 : vector<17x256xf32>
    %cst_14 = arith.constant dense<0.000000e+00> : vector<17xf32>
    %94 = vector.multi_reduction <add>, %93, %cst_14 [1] : vector<17x256xf32> to vector<17xf32>
    %95 = vector.shape_cast %94 : vector<17xf32> to vector<17x1xf32>
    %cst_15 = arith.constant 2.560000e+02 : f32
    %96 = vector.broadcast %cst_15 : f32 to vector<17x1xf32>
    %97 = arith.divf %95, %96 : vector<17x1xf32>
    %cst_16 = arith.constant dense<0.000000e+00> : vector<1xf32>
    %98 = vector.multi_reduction <add>, %97, %cst_16 [0] : vector<17x1xf32> to vector<1xf32>
    %99 = vector.shape_cast %98 : vector<1xf32> to vector<1x1xf32>
    %cst_17 = arith.constant 1.700000e+01 : f32
    %100 = vector.broadcast %cst_17 : f32 to vector<1x1xf32>
    %101 = arith.divf %99, %100 : vector<1x1xf32>
    %cst_18 = arith.constant 9.99999974E-6 : f32
    %102 = vector.broadcast %cst_18 : f32 to vector<1x1xf32>
    %103 = arith.addf %101, %102 : vector<1x1xf32>
    %104 = math.rsqrt %103 : vector<1x1xf32>
    %105 = vector.broadcast %104 : vector<1x1xf32> to vector<17x256xf32>
    %106 = arith.mulf %92, %105 : vector<17x256xf32>
    %c0_19 = arith.constant 0 : index
    %c0_20 = arith.constant 0 : index
    %107 = vector.load %arg6[%c0_19, %c0_20] : memref<17x1xf32, #tpu.memory_space<vmem>>, vector<17x1xf32>
    %108 = vector.broadcast %107 : vector<17x1xf32> to vector<17x256xf32>
    %109 = arith.mulf %106, %108 : vector<17x256xf32>
    %c0_21 = arith.constant 0 : index
    %c0_22 = arith.constant 0 : index
    %110 = vector.load %arg7[%c0_21, %c0_22] : memref<17x1xf32, #tpu.memory_space<vmem>>, vector<17x1xf32>
    %111 = vector.broadcast %110 : vector<17x1xf32> to vector<17x256xf32>
    %112 = arith.addf %109, %111 : vector<17x256xf32>
    %cst_23 = arith.constant 0.707106769 : f32
    %113 = vector.broadcast %cst_23 : f32 to vector<17x256xf32>
    %114 = arith.mulf %112, %113 : vector<17x256xf32>
    %115 = math.absf %114 : vector<17x256xf32>
    %cst_24 = arith.constant 0.327591091 : f32
    %116 = vector.broadcast %cst_24 : f32 to vector<17x256xf32>
    %117 = arith.mulf %116, %115 : vector<17x256xf32>
    %cst_25 = arith.constant 1.000000e+00 : f32
    %118 = vector.broadcast %cst_25 : f32 to vector<17x256xf32>
    %119 = arith.addf %118, %117 : vector<17x256xf32>
    %cst_26 = arith.constant 1.000000e+00 : f32
    %120 = vector.broadcast %cst_26 : f32 to vector<17x256xf32>
    %121 = arith.divf %120, %119 : vector<17x256xf32>
    %cst_27 = arith.constant 1.06140542 : f32
    %122 = vector.broadcast %cst_27 : f32 to vector<17x256xf32>
    %123 = arith.mulf %121, %122 : vector<17x256xf32>
    %cst_28 = arith.constant -1.45315206 : f32
    %124 = vector.broadcast %cst_28 : f32 to vector<17x256xf32>
    %125 = arith.addf %124, %123 : vector<17x256xf32>
    %126 = arith.mulf %121, %125 : vector<17x256xf32>
    %cst_29 = arith.constant 1.42141378 : f32
    %127 = vector.broadcast %cst_29 : f32 to vector<17x256xf32>
    %128 = arith.addf %127, %126 : vector<17x256xf32>
    %129 = arith.mulf %121, %128 : vector<17x256xf32>
    %cst_30 = arith.constant -0.284496725 : f32
    %130 = vector.broadcast %cst_30 : f32 to vector<17x256xf32>
    %131 = arith.addf %130, %129 : vector<17x256xf32>
    %132 = arith.mulf %121, %131 : vector<17x256xf32>
    %cst_31 = arith.constant 0.254829586 : f32
    %133 = vector.broadcast %cst_31 : f32 to vector<17x256xf32>
    %134 = arith.addf %133, %132 : vector<17x256xf32>
    %135 = arith.mulf %121, %134 : vector<17x256xf32>
    %cst_32 = arith.constant 0.000000e+00 : f32
    %136 = vector.broadcast %cst_32 : f32 to vector<17x256xf32>
    %137 = arith.subf %136, %115 : vector<17x256xf32>
    %138 = arith.mulf %137, %115 : vector<17x256xf32>
    %139 = math.exp %138 : vector<17x256xf32>
    %140 = arith.mulf %135, %139 : vector<17x256xf32>
    %cst_33 = arith.constant 1.000000e+00 : f32
    %141 = vector.broadcast %cst_33 : f32 to vector<17x256xf32>
    %142 = arith.subf %141, %140 : vector<17x256xf32>
    %cst_34 = arith.constant 0.000000e+00 : f32
    %143 = vector.broadcast %cst_34 : f32 to vector<17x256xf32>
    %144 = arith.cmpf olt, %114, %143 : vector<17x256xf32>
    %cst_35 = arith.constant 0.000000e+00 : f32
    %145 = vector.broadcast %cst_35 : f32 to vector<17x256xf32>
    %146 = arith.subf %145, %142 : vector<17x256xf32>
    %147 = arith.select %144, %146, %142 : vector<17x256xi1>, vector<17x256xf32>
    %cst_36 = arith.constant 5.000000e-01 : f32
    %148 = vector.broadcast %cst_36 : f32 to vector<17x256xf32>
    %149 = arith.mulf %148, %112 : vector<17x256xf32>
    %cst_37 = arith.constant 1.000000e+00 : f32
    %150 = vector.broadcast %cst_37 : f32 to vector<17x256xf32>
    %151 = arith.addf %150, %147 : vector<17x256xf32>
    %152 = arith.mulf %149, %151 : vector<17x256xf32>
    %c17_i32_38 = arith.constant 17 : i32
    %153 = tpu.dynamic_rotate %152 by %c17_i32_38 dim 1 : vector<17x256xf32>, i32 -> vector<17x256xf32>
    %154 = vector.extract_strided_slice %1 {offsets = [0, 0], sizes = [1, 256], strides = [1, 1]} : vector<9x256xf32> to vector<1x256xf32>
    %155 = vector.broadcast %154 : vector<1x256xf32> to vector<17x256xf32>
    %156 = arith.mulf %153, %155 : vector<17x256xf32>
    %c16_i32_39 = arith.constant 16 : i32
    %157 = tpu.dynamic_rotate %152 by %c16_i32_39 dim 1 : vector<17x256xf32>, i32 -> vector<17x256xf32>
    %158 = vector.extract_strided_slice %1 {offsets = [1, 0], sizes = [1, 256], strides = [1, 1]} : vector<9x256xf32> to vector<1x256xf32>
    %159 = vector.broadcast %158 : vector<1x256xf32> to vector<17x256xf32>
    %160 = arith.mulf %157, %159 : vector<17x256xf32>
    %c15_i32_40 = arith.constant 15 : i32
    %161 = tpu.dynamic_rotate %152 by %c15_i32_40 dim 1 : vector<17x256xf32>, i32 -> vector<17x256xf32>
    %162 = vector.extract_strided_slice %1 {offsets = [2, 0], sizes = [1, 256], strides = [1, 1]} : vector<9x256xf32> to vector<1x256xf32>
    %163 = vector.broadcast %162 : vector<1x256xf32> to vector<17x256xf32>
    %164 = arith.mulf %161, %163 : vector<17x256xf32>
    %c1_i32_41 = arith.constant 1 : i32
    %165 = tpu.dynamic_rotate %152 by %c1_i32_41 dim 1 : vector<17x256xf32>, i32 -> vector<17x256xf32>
    %166 = vector.extract_strided_slice %1 {offsets = [3, 0], sizes = [1, 256], strides = [1, 1]} : vector<9x256xf32> to vector<1x256xf32>
    %167 = vector.broadcast %166 : vector<1x256xf32> to vector<17x256xf32>
    %168 = arith.mulf %165, %167 : vector<17x256xf32>
    %169 = vector.extract_strided_slice %1 {offsets = [4, 0], sizes = [1, 256], strides = [1, 1]} : vector<9x256xf32> to vector<1x256xf32>
    %170 = vector.broadcast %169 : vector<1x256xf32> to vector<17x256xf32>
    %171 = arith.mulf %152, %170 : vector<17x256xf32>
    %c255_i32_42 = arith.constant 255 : i32
    %172 = tpu.dynamic_rotate %152 by %c255_i32_42 dim 1 : vector<17x256xf32>, i32 -> vector<17x256xf32>
    %173 = vector.extract_strided_slice %1 {offsets = [5, 0], sizes = [1, 256], strides = [1, 1]} : vector<9x256xf32> to vector<1x256xf32>
    %174 = vector.broadcast %173 : vector<1x256xf32> to vector<17x256xf32>
    %175 = arith.mulf %172, %174 : vector<17x256xf32>
    %c241_i32_43 = arith.constant 241 : i32
    %176 = tpu.dynamic_rotate %152 by %c241_i32_43 dim 1 : vector<17x256xf32>, i32 -> vector<17x256xf32>
    %177 = vector.extract_strided_slice %1 {offsets = [6, 0], sizes = [1, 256], strides = [1, 1]} : vector<9x256xf32> to vector<1x256xf32>
    %178 = vector.broadcast %177 : vector<1x256xf32> to vector<17x256xf32>
    %179 = arith.mulf %176, %178 : vector<17x256xf32>
    %c240_i32_44 = arith.constant 240 : i32
    %180 = tpu.dynamic_rotate %152 by %c240_i32_44 dim 1 : vector<17x256xf32>, i32 -> vector<17x256xf32>
    %181 = vector.extract_strided_slice %1 {offsets = [7, 0], sizes = [1, 256], strides = [1, 1]} : vector<9x256xf32> to vector<1x256xf32>
    %182 = vector.broadcast %181 : vector<1x256xf32> to vector<17x256xf32>
    %183 = arith.mulf %180, %182 : vector<17x256xf32>
    %c239_i32_45 = arith.constant 239 : i32
    %184 = tpu.dynamic_rotate %152 by %c239_i32_45 dim 1 : vector<17x256xf32>, i32 -> vector<17x256xf32>
    %185 = vector.extract_strided_slice %1 {offsets = [8, 0], sizes = [1, 256], strides = [1, 1]} : vector<9x256xf32> to vector<1x256xf32>
    %186 = vector.broadcast %185 : vector<1x256xf32> to vector<17x256xf32>
    %187 = arith.mulf %184, %186 : vector<17x256xf32>
    %188 = tpu.concatenate %156, %160, %164, %168, %171, %175, %179, %183, %187 in 0 : vector<17x256xf32>, vector<17x256xf32>, vector<17x256xf32>, vector<17x256xf32>, vector<17x256xf32>, vector<17x256xf32>, vector<17x256xf32>, vector<17x256xf32>, vector<17x256xf32> -> vector<153x256xf32>
    %189 = arith.truncf %188 : vector<153x256xf32> to vector<153x256xbf16>
    %c0_46 = arith.constant 0 : index
    %c0_47 = arith.constant 0 : index
    %190 = vector.load %arg8[%c0_46, %c0_47] : memref<8x153xbf16, #tpu.memory_space<vmem>>, vector<8x153xbf16>
    %cst_48 = arith.constant dense<0.000000e+00> : vector<8x256xf32>
    %191 = tpu.matmul %190, %189, %cst_48 {dimension_numbers = #tpu.dot_dimension_numbers<[1], [0], [0], [1], [0, 0, 1, 1], [], []>} : vector<8x153xbf16>, vector<153x256xbf16>, vector<8x256xf32> -> vector<8x256xf32>
    %c0_49 = arith.constant 0 : index
    %c0_50 = arith.constant 0 : index
    %192 = vector.load %arg9[%c0_49, %c0_50] : memref<8x1xf32, #tpu.memory_space<vmem>>, vector<8x1xf32>
    %193 = vector.broadcast %192 : vector<8x1xf32> to vector<8x256xf32>
    %194 = arith.addf %191, %193 : vector<8x256xf32>
    %cst_51 = arith.constant dense<0.000000e+00> : vector<8xf32>
    %195 = vector.multi_reduction <add>, %194, %cst_51 [1] : vector<8x256xf32> to vector<8xf32>
    %196 = vector.shape_cast %195 : vector<8xf32> to vector<8x1xf32>
    %cst_52 = arith.constant 2.560000e+02 : f32
    %197 = vector.broadcast %cst_52 : f32 to vector<8x1xf32>
    %198 = arith.divf %196, %197 : vector<8x1xf32>
    %cst_53 = arith.constant dense<0.000000e+00> : vector<1xf32>
    %199 = vector.multi_reduction <add>, %198, %cst_53 [0] : vector<8x1xf32> to vector<1xf32>
    %200 = vector.shape_cast %199 : vector<1xf32> to vector<1x1xf32>
    %cst_54 = arith.constant 8.000000e+00 : f32
    %201 = vector.broadcast %cst_54 : f32 to vector<1x1xf32>
    %202 = arith.divf %200, %201 : vector<1x1xf32>
    %203 = vector.broadcast %202 : vector<1x1xf32> to vector<8x256xf32>
    %204 = arith.subf %194, %203 : vector<8x256xf32>
    %205 = arith.mulf %204, %204 : vector<8x256xf32>
    %cst_55 = arith.constant dense<0.000000e+00> : vector<8xf32>
    %206 = vector.multi_reduction <add>, %205, %cst_55 [1] : vector<8x256xf32> to vector<8xf32>
    %207 = vector.shape_cast %206 : vector<8xf32> to vector<8x1xf32>
    %cst_56 = arith.constant 2.560000e+02 : f32
    %208 = vector.broadcast %cst_56 : f32 to vector<8x1xf32>
    %209 = arith.divf %207, %208 : vector<8x1xf32>
    %cst_57 = arith.constant dense<0.000000e+00> : vector<1xf32>
    %210 = vector.multi_reduction <add>, %209, %cst_57 [0] : vector<8x1xf32> to vector<1xf32>
    %211 = vector.shape_cast %210 : vector<1xf32> to vector<1x1xf32>
    %cst_58 = arith.constant 8.000000e+00 : f32
    %212 = vector.broadcast %cst_58 : f32 to vector<1x1xf32>
    %213 = arith.divf %211, %212 : vector<1x1xf32>
    %cst_59 = arith.constant 9.99999974E-6 : f32
    %214 = vector.broadcast %cst_59 : f32 to vector<1x1xf32>
    %215 = arith.addf %213, %214 : vector<1x1xf32>
    %216 = math.rsqrt %215 : vector<1x1xf32>
    %217 = vector.broadcast %216 : vector<1x1xf32> to vector<8x256xf32>
    %218 = arith.mulf %204, %217 : vector<8x256xf32>
    %c0_60 = arith.constant 0 : index
    %c0_61 = arith.constant 0 : index
    %219 = vector.load %arg10[%c0_60, %c0_61] : memref<8x256xf32, #tpu.memory_space<vmem>>, vector<8x256xf32>
    %220 = arith.mulf %218, %219 : vector<8x256xf32>
    %c0_62 = arith.constant 0 : index
    %c0_63 = arith.constant 0 : index
    %221 = vector.load %arg11[%c0_62, %c0_63] : memref<8x256xf32, #tpu.memory_space<vmem>>, vector<8x256xf32>
    %222 = arith.addf %220, %221 : vector<8x256xf32>
    %c0_64 = arith.constant 0 : index
    %c0_65 = arith.constant 0 : index
    %223 = vector.load %arg12[%c0_64, %c0_65] : memref<8x256xf32, #tpu.memory_space<vmem>>, vector<8x256xf32>
    tpu.vector_store %arg12[%c0_64, %c0_65], %222 {strides = array<i32>} : memref<8x256xf32, #tpu.memory_space<vmem>>, vector<8x256xf32>,
    return
  }
  func.func @transform_0(%arg0: i32) -> (i32, i32) {
    %c0_i32 = arith.constant 0 : i32
    %c0_i32_0 = arith.constant 0 : i32
    return %c0_i32, %arg0 : i32, i32
  }
  func.func @transform_1(%arg0: i32) -> (i32, i32) {
    %c0_i32 = arith.constant 0 : i32
    %c0_i32_0 = arith.constant 0 : i32
    return %c0_i32, %arg0 : i32, i32
  }
  func.func @transform_2(%arg0: i32) -> (i32, i32) {
    %c0_i32 = arith.constant 0 : i32
    %c0_i32_0 = arith.constant 0 : i32
    return %c0_i32, %arg0 : i32, i32
  }
  func.func @transform_3(%arg0: i32) -> (i32, i32) {
    %c0_i32 = arith.constant 0 : i32
    %c0_i32_0 = arith.constant 0 : i32
    %c0_i32_1 = arith.constant 0 : i32
    return %c0_i32, %c0_i32_0 : i32, i32
  }
  func.func @transform_4(%arg0: i32) -> (i32, i32) {
    %c0_i32 = arith.constant 0 : i32
    %c0_i32_0 = arith.constant 0 : i32
    %c0_i32_1 = arith.constant 0 : i32
    return %c0_i32, %c0_i32_0 : i32, i32
  }
  func.func @transform_5(%arg0: i32) -> (i32, i32) {
    %c0_i32 = arith.constant 0 : i32
    %c0_i32_0 = arith.constant 0 : i32
    %c0_i32_1 = arith.constant 0 : i32
    return %c0_i32, %c0_i32_0 : i32, i32
  }
  func.func @transform_6(%arg0: i32) -> (i32, i32) {
    %c0_i32 = arith.constant 0 : i32
    %c0_i32_0 = arith.constant 0 : i32
    %c0_i32_1 = arith.constant 0 : i32
    return %c0_i32, %c0_i32_0 : i32, i32
  }
  func.func @transform_7(%arg0: i32) -> (i32, i32) {
    %c0_i32 = arith.constant 0 : i32
    %c0_i32_0 = arith.constant 0 : i32
    %c0_i32_1 = arith.constant 0 : i32
    return %c0_i32, %c0_i32_0 : i32, i32
  }
  func.func @transform_8(%arg0: i32) -> (i32, i32) {
    %c0_i32 = arith.constant 0 : i32
    %c0_i32_0 = arith.constant 0 : i32
    %c0_i32_1 = arith.constant 0 : i32
    return %c0_i32, %c0_i32_0 : i32, i32
  }
  func.func @transform_9(%arg0: i32) -> (i32, i32) {
    %c0_i32 = arith.constant 0 : i32
    %c0_i32_0 = arith.constant 0 : i32
    %c0_i32_1 = arith.constant 0 : i32
    return %c0_i32, %c0_i32_0 : i32, i32
  }
  func.func @transform_10(%arg0: i32) -> (i32, i32) {
    %c0_i32 = arith.constant 0 : i32
    %c0_i32_0 = arith.constant 0 : i32
    %c0_i32_1 = arith.constant 0 : i32
    return %c0_i32, %c0_i32_0 : i32, i32
  }
  func.func @transform_11(%arg0: i32) -> (i32, i32) {
    %c0_i32 = arith.constant 0 : i32
    %c0_i32_0 = arith.constant 0 : i32
    return %c0_i32, %arg0 : i32, i32
  }
}

</mosaic_0001>

<bundles_post_ra>
// kernel: attention_block_forward.3
= control target key start
LH: loop header
LB: loop body
LE: loop exit
PB: predicated region body
PF: predicated region fallthrough
CT: control target
= control target key end

     0   :  { %s861_s30 = smov 0   ;;  %s923_s0 = inlined_call_operand.vmem [shape: f32[8,512], index: 0, kind: input, shape index: {}]   ;;  %s924_s1 = inlined_call_operand.vmem [shape: f32[8,1], index: 1, kind: input, shape index: {}]   ;;  %s925_s2 = inlined_call_operand.vmem [shape: f32[8,1], index: 2, kind: input, shape index: {}]   ;;  %s926_s3 = inlined_call_operand.vmem [shape: f32[4,8], index: 3, kind: input, shape index: {}]   ;;  %s927_s4 = inlined_call_operand.vmem [shape: f32[8,4], index: 4, kind: input, shape index: {}]   ;;  %s928_s5 = inlined_call_operand.vmem [shape: f32[8,8], index: 5, kind: input, shape index: {}]   ;;  %s929_s6 = inlined_call_operand.vmem [shape: f32[8,8], index: 6, kind: input, shape index: {}]   ;;  %s930_s7 = inlined_call_operand.vmem [shape: f32[8,512], index: 7, kind: output, shape index: {0}]   ;;  %s931_s8 = inlined_call_operand.vmem [shape: f32[3,512], index: 8, kind: output, shape index: {1}]   ;;  %s932_s9 = inlined_call_operand.vmem [shape: f32[8,512], index: 9, kind: output, shape index: {2}]  }
   0x1 LB: > { %s748_s5 = sadd.s32 4294967295, %s806_s30   ;;  %p752_p0 = scmp.ge.s32.totalorder %s806_s30, 1  ;;  %s806_s30 = sphi %s861_s30, %s20_s30  }
   0x2   : > { %p293_p1 = scmp.lt.s32.totalorder %s806_s30, 3 }
   0x4   : > { %p294_p2 = pnand %p752_p0, %p293_p1 }
   0x5   : > { %s753_s6 = sshll.u32 (!%p294_p2), %s748_s5, 1 }
   0x6   : > { %297 = sbr.rel (%p294_p2) target bundleno = 1016 (0x3f8), region = 48  ;;  %p340_p3 = scmp.lt.s32.totalorder (!%p294_p2), %s753_s6, 3 }
   0xb   : > { %s934_s6 = smov (!%p340_p3, %s753_s6), 3  ;;  %v382_v3 = vld [vmem:[%s924_s1] sm:$0xff]  ;;  %v808_v4 = vmov 0   ;;  %vm439_vm0 = vcmask 1040384   ;;  %vm442_vm1 = vcmask 1041408   ;;  %v809_v60 = vmov 0.0  }
   0xc   : > { %s872_s10 = sshll.u32 %s934_s6, 3  ;;  %792 = vset.pattern.permute.xlu1 %v808_v4  ;;  %793 = vset.pattern.permute.xlu0 %v808_v4  ;;  %v390_v5 = vld [vmem:[%s925_s2] sm:$0xff]  ;;  %s758_s21 = sshll.u32 %s934_s6, 2  ;;  %vm810_vm2 = vmmov 0   ;;  %vm455_vm3 = vcmask 64512   ;;  %vm535_vm4 = vcmask 1043456  }
   0xd   : > { %s343_s13 = scalar_lea.vmem %s923_s0, %s872_s10  ;;  %385 = vperm.xlu1 %792, %v382_v3   ;;  %s349_s20 = scalar_lea.vmem %s930_s7, %s872_s10  ;;  %771 = vmatprep.subr.mxu0 %v809_v60  ;;  %v454_v4 = vld [vmem:[%s926_s3] sm:$0xf]  ;;  %vm531_vm5 = vcmask 31744  }
   0xe   : > { %v363_v0 = vld [vmem:[%s343_s13] sm:$0xff]  ;;  %v364_v1 = vld [vmem:[%s343_s13 + $0x8] sm:$0xff]  ;;  %776 = vmatprep.subr.mxu1 %v809_v60  ;;  %s355_s24 = scalar_lea.vmem %s931_s8, %s758_s21  ;;  %773 = vmatprep.mubr.msk.f32.mxu0 %vm810_vm2, %v809_v60  ;;  %s361_s6 = scalar_lea.vmem %s932_s9, %s872_s10 }
   0xf   : > { %v365_v2 = vadd.f32 %v364_v1, %v363_v0  ;;  %778 = vmatprep.mubr.msk.f32.mxu1 %vm810_vm2, %v809_v60 }
  0x11   : > { %366 = vadd.xlane.f32.xlu0 %v365_v2  ;;  %393 = vperm.xlu1 %792, %v390_v5  }
  0x88   : > { %v386_v16 = vpop.permute.xlu1 %385 }
  0x8c   : > { %v394_v22 = vpop.permute.xlu1 %393 }
  0x9a   : > { %v367_v6 = vpop.xlane.xlu0 %366 }
  0x9b   : > { %v369_v7 = vmul.f32 0.00390625, %v367_v6 }
  0x9d   : > { %v370_v8 = vsub.f32 %v363_v0, %v369_v7  ;;  %v371_v9 = vsub.f32 %v364_v1, %v369_v7  ;;  %v530_v7 = vld [vmem:[%s927_s4] sm:$0xff] }
  0x9f   : > { %v372_v10 = vmul.f32 %v370_v8, %v370_v8  ;;  %v373_v11 = vmul.f32 %v371_v9, %v371_v9 }
  0xa1   : > { %v374_v12 = vadd.f32 %v373_v11, %v372_v10 }
  0xa3   : > { %375 = vadd.xlane.f32.xlu0 %v374_v12 }
 0x12c   : > { %v376_v13 = vpop.xlane.xlu0 %375 }
 0x12d   : > { %v377_v14 = vmul.f32 0.00390625, %v376_v13 }
 0x12f   : > { %v378_v15 = vadd.f32 1e-05, %v377_v14 }
 0x131   : > { %794 = vrsqrt.f32 %v378_v15 }
 0x13e   : > { %v795_v17 = vpop.eup %794 }
 0x13f   : > { %v380_v18 = vmul.f32 %v795_v17, %v370_v8  ;;  %v381_v19 = vmul.f32 %v795_v17, %v371_v9 }
 0x141   : > { %v388_v20 = vmul.f32 %v386_v16, %v380_v18  ;;  %v389_v21 = vmul.f32 %v386_v16, %v381_v19 }
 0x143   : > { %v888_v23 = vadd.f32 %v394_v22, %v388_v20  ;;  %v890_v24 = vadd.f32 %v394_v22, %v389_v21 }
 0x145   : > { %398 = vst [vmem:[%s349_s20] sm:$0xff] %v888_v23  ;;  %v400_v25 = vrot.slane %v888_v23, 4  ;;  %v406_v26 = vrot.slane %v890_v24, 4  ;;  %v450_v27 = vadd.f32 %v890_v24, %v888_v23  ;;  %399 = vst [vmem:[%s349_s20 + $0x8] sm:$0xff] %v890_v24 }
 0x147   : > { %v401_v28 = vmin.f32 %v888_v23, %v400_v25  ;;  %v407_v29 = vmin.f32 %v890_v24, %v406_v26  ;;  %v413_v30 = vadd.f32 %v400_v25, %v888_v23  ;;  %v419_v31 = vadd.f32 %v406_v26, %v890_v24  ;;  %451 = vadd.xlane.f32.xlu0 %v450_v27 }
 0x148   : > { %v428_v32 = vmax.f32 %v888_v23, %v400_v25  ;;  %v434_v33 = vmax.f32 %v890_v24, %v406_v26 }
 0x149   : > { %v402_v34 = vrot.slane %v401_v28, 2  ;;  %v408_v35 = vrot.slane %v407_v29, 2  ;;  %v414_v36 = vrot.slane %v413_v30, 2  ;;  %v420_v37 = vrot.slane %v419_v31, 2 }
 0x14a   : > { %v429_v38 = vrot.slane %v428_v32, 2  ;;  %v435_v39 = vrot.slane %v434_v33, 2 }
 0x14b   : > { %v403_v40 = vmin.f32 %v401_v28, %v402_v34  ;;  %v409_v41 = vmin.f32 %v407_v29, %v408_v35  ;;  %v415_v42 = vadd.f32 %v414_v36, %v413_v30  ;;  %v421_v43 = vadd.f32 %v420_v37, %v419_v31 }
 0x14c   : > { %v430_v44 = vmax.f32 %v428_v32, %v429_v38  ;;  %v436_v45 = vmax.f32 %v434_v33, %v435_v39 }
 0x14d   : > { %v404_v46 = vrot.slane %v403_v40, 1  ;;  %v410_v47 = vrot.slane %v409_v41, 1  ;;  %v416_v48 = vrot.slane %v415_v42, 1  ;;  %v422_v49 = vrot.slane %v421_v43, 1 }
 0x14e   : > { %v431_v50 = vrot.slane %v430_v44, 1  ;;  %v437_v51 = vrot.slane %v436_v45, 1 }
 0x14f   : > { %v417_v52 = vadd.f32 %v416_v48, %v415_v42  ;;  %v423_v53 = vadd.f32 %v422_v49, %v421_v43  ;;  %v405_v54 = vmin.f32 %v403_v40, %v404_v46  ;;  %v411_v55 = vmin.f32 %v409_v41, %v410_v47 }
 0x150   : > { %v432_v58 = vmax.f32 %v430_v44, %v431_v50  ;;  %v438_v59 = vmax.f32 %v436_v45, %v437_v51 }
 0x151   : > { %v425_v56 = vmul.f32 0.125, %v417_v52  ;;  %v426_v57 = vmul.f32 0.125, %v423_v53 }
 0x153   : > { %v440_v61 = vsel %vm439_vm0, %v405_v54, %v425_v56  ;;  %v441_v62 = vsel %vm439_vm0, %v411_v55, %v426_v57 }
 0x154   : > { %v443_v63 = vsel %vm442_vm1, %v440_v61, %v432_v58  ;;  %v444_v0 = vsel %vm442_vm1, %v441_v62, %v438_v59 }
 0x155   : > { %v447_v1 = vcombine.low %v443_v63, %v444_v0 }
 0x157   : > { %449 = vst [vmem:[%s355_s24] sm:$0x77] %v447_v1 }
 0x1d0   : > { %v452_v2 = vpop.xlane.xlu0 %451 }
 0x1d1   : > { %v453_v3 = vmul.f32 0.00390625, %v452_v2 }
 0x1d3   : > { %772 = vmatpush3.msra.mxu0 %v453_v3 }
 0x1d4   : > { %774 = vmatmul.mubr.msk.f32.vlgmr.msra.gmra.mxu0 %vm455_vm3, %v454_v4 }
 0x294   : > { %v525_v5 = vpop.f32.mrf.mxu0 }
 0x295   : > { %v529_v6 = vmax.f32 %v525_v5, 0.0 }
 0x296   : > { %v775_v8 = vpop.f32.mrf.mxu0 }
 0x297   : > { %777 = vmatpush3.msk.msra.mxu1 %vm535_vm4, %v529_v6 }
 0x298   : > { %779 = vmatmul.mubr.msk.f32.vlgmr.msra.gmra.mxu1 %vm531_vm5, %v530_v7 }
 0x358   : > { %v605_v9 = vpop.f32.mrf.mxu1 }
 0x359   : > { %v764_v10 = vmul.f32 -1.442695, %v605_v9 }
 0x35a   : > { %v780_v11 = vpop.f32.mrf.mxu1 }
 0x35b   : > { %796 = vpow2.f32 %v764_v10 }
 0x368   : > { %v797_v12 = vpop.eup %796 }
 0x369   : > { %v612_v13 = vadd.f32 1.0, %v797_v12 }
 0x36b   : > { %798 = vrcp.f32 %v612_v13 }
 0x378   : > { %v799_v14 = vpop.eup %798 }
 0x379   : > { %617 = vperm.xlu1 %792, %v799_v14  }
 0x3f4   : > { %v618_v15 = vpop.permute.xlu1 %617 }
 0x3f5   : > { %v620_v16 = vmul.f32 %v618_v15, %v888_v23  ;;  %v621_v17 = vmul.f32 %v618_v15, %v890_v24 }
 0x3f7   : > { %622 = vst [vmem:[%s361_s6] sm:$0xff] %v620_v16  ;;  %623 = vst [vmem:[%s361_s6 + $0x8] sm:$0xff] %v621_v17 }
 0x3f8 PF: > { %s20_s30 = sadd.s32 1, %s806_s30  }
 0x3f9   : > { %p17_p4 = scmp.ge.s32.totalorder %s20_s30, 4  }
 0x3fb   :  { %19 = sbr.rel (!%p17_p4) target bundleno = 1 (0x1), region = 102 }

// kernel: attention_block_forward.4
= control target key start
LH: loop header
LB: loop body
LE: loop exit
PB: predicated region body
PF: predicated region fallthrough
CT: control target
= control target key end

     0   :  { %s780_s29 = smov 96   ;;  %vm192_vm0 = vcmask 261120   ;;  %vm391_vm1 = vcmask 1043456   ;;  %vm366_vm2 = vcmask 31744   ;;  %s909_s1 = inlined_call_operand.vmem [shape: bf16[128,96], index: 1, kind: input, shape index: {}]   ;;  %s910_s0 = inlined_call_operand.vmem [shape: bf16[32,128], index: 0, kind: input, shape index: {}]   ;;  %s911_s3 = inlined_call_operand.vmem [shape: f32[32,4], index: 3, kind: input, shape index: {}]   ;;  %s912_s2 = inlined_call_operand.vmem [shape: f32[1,96], index: 2, kind: input, shape index: {}]   ;;  %s913_s4 = inlined_call_operand.vmem [shape: f32[4,32], index: 4, kind: input, shape index: {}]   ;;  %s914_s5 = inlined_call_operand.vmem [shape: bf16[32,128], index: 5, kind: input, shape index: {}]   ;;  %s915_s6 = inlined_call_operand.vmem [shape: f32[1,128], index: 6, kind: input, shape index: {}]   ;;  %s916_s7 = inlined_call_operand.vmem [shape: f32[32,128], index: 7, kind: output, shape index: {}]  }
   0x1   :  { %v744_v0 = vld [vmem:[%s909_s1 + $0x38] sm:$0xff]   ;;  %v745_v1 = vld [vmem:[%s909_s1 + $0x30] sm:$0xff]   ;;  %v746_v2 = vld [vmem:[%s909_s1 + $0x28] sm:$0xff]  }
   0x2   :  { %680 = vmatprep.subr.bf16.mxu0 %v744_v0  ;;  %v747_v3 = vld [vmem:[%s909_s1 + $0x20] sm:$0xff]   ;;  %v748_v5 = vld [vmem:[%s909_s1 + $0x18] sm:$0xff]   ;;  %v749_v6 = vld [vmem:[%s909_s1 + $0x10] sm:$0xff]  }
   0x3   :  { %681 = vmatpush3.bf16.msra.mxu0 %v744_v0  ;;  %v752_v4 = vld [vmem:[%s910_s0] sm:$0xff]   ;;  %v750_v7 = vld [vmem:[%s909_s1 + $0x8] sm:$0xff]   ;;  %v166_v10 = vld [vmem:[%s911_s3 + $0x18] sm:$0xff] }
   0x4   :  { %682 = vmatprep.subr.bf16.mxu0 %v745_v1  ;;  %696 = vmatprep.mubr.bf16.mxu0 %v752_v4  ;;  %v751_v8 = vld [vmem:[%s909_s1] sm:$0xff]   ;;  %v753_v9 = vld [vmem:[%s910_s0 + $0x8] sm:$0xff]   ;;  %v165_v11 = vld [vmem:[%s911_s3 + $0x10] sm:$0xff] }
   0x5   :  { %700 = vmatprep.subr.mxu1 %v166_v10  ;;  %v164_v12 = vld [vmem:[%s911_s3 + $0x8] sm:$0xff]  ;;  %v163_v13 = vld [vmem:[%s911_s3] sm:$0xff]  ;;  %s781_s3 = smov 64  }
   0x6   :  { %701 = vmatpush3.msra.mxu1 %v166_v10  ;;  %v612_v14 = vld [vmem:[%s912_s2] ss:$0 sm:$0xff] }
   0x7   :  { %683 = vmatpush3.bf16.msra.mxu0 %v745_v1  ;;  %702 = vmatprep.subr.mxu1 %v165_v11  ;;  %v167_v35 = vld [vmem:[%s913_s4] sm:$0xf] }
   0x8   :  { %684 = vmatprep.subr.bf16.mxu0 %v746_v2  ;;  %703 = vmatpush3.msra.mxu1 %v165_v11 }
   0x9   :  { %704 = vmatprep.subr.mxu1 %v164_v12 }
   0xa   :  { %705 = vmatpush3.msra.mxu1 %v164_v12 }
   0xb   :  { %685 = vmatpush3.bf16.msra.mxu0 %v746_v2  ;;  %706 = vmatprep.subr.mxu1 %v163_v13 }
   0xc   :  { %686 = vmatprep.subr.bf16.mxu0 %v747_v3  ;;  %707 = vmatpush3.msra.mxu1 %v163_v13 }
   0xd   :  { %720 = vmatprep.subr.msk.mxu1 %vm391_vm1, %v167_v35 }
   0xf   :  { %687 = vmatpush3.bf16.msra.mxu0 %v747_v3 }
  0x10   :  { %688 = vmatprep.subr.bf16.mxu0 %v748_v5 }
  0x13   :  { %689 = vmatpush3.bf16.msra.mxu0 %v748_v5 }
  0x14   :  { %690 = vmatprep.subr.bf16.mxu0 %v749_v6 }
  0x17   :  { %691 = vmatpush3.bf16.msra.mxu0 %v749_v6 }
  0x18   :  { %692 = vmatprep.subr.bf16.mxu0 %v750_v7 }
  0x1b   :  { %693 = vmatpush3.bf16.msra.mxu0 %v750_v7 }
  0x1c   :  { %694 = vmatprep.subr.bf16.mxu0 %v751_v8 }
  0x1f   :  { %695 = vmatpush3.bf16.msra.mxu0 %v751_v8 }
  0x22   :  { %697 = vmatmul.mubr.bf16.vlgmr.msra.gmra.mxu0 %v753_v9 }
  0xe2   :  { %v698_v15 = vpop.f32.mrf.mxu0 }
  0xe3   :  { %v157_v16 = vadd.f32 %v698_v15, %v612_v14 }
  0xe4   :  { %v148_v17 = vpop.f32.mrf.mxu0 }
  0xe5   :  { %v149_v18 = vadd.f32 %v612_v14, %v148_v17  ;;  %180 = vrot.lane.b32.xlu1 %v157_v16, %s780_s29 }
  0xe6   :  { %v699_v19 = vpop.f32.mrf.mxu0 }
  0xe7   :  { %v160_v20 = vadd.f32 %v699_v19, %v612_v14  ;;  %170 = vrot.lane.b32.xlu0 %v149_v18, %s780_s29 }
  0xe8   :  { %v151_v21 = vpop.f32.mrf.mxu0 }
  0xe9   :  { %v152_v22 = vadd.f32 %v612_v14, %v151_v21  ;;  %182 = vrot.lane.b32.xlu1 %v160_v20, %s780_s29 }
  0xeb   :  { %172 = vrot.lane.b32.xlu0 %v152_v22, %s780_s29 }
  0xed   :  { %502 = vrot.lane.b32.xlu1 %v152_v22, %s781_s3 }
  0xef   :  { %500 = vrot.lane.b32.xlu0 %v149_v18, %s781_s3 }
  0xf1   :  { %510 = vrot.lane.b32.xlu1 %v160_v20, %s781_s3 }
  0xf3   :  { %508 = vrot.lane.b32.xlu0 %v157_v16, %s781_s3 }
 0x157   :  { %v181_v23 = vpop.permute.xlu1 %180 }
 0x158   :  { %v186_v28 = vmul.f32 %v181_v23, %v149_v18  ;;  %v190_v33 = vmul.f32 %v181_v23, %v157_v16 }
 0x159   :  { %v171_v24 = vpop.permute.xlu0 %170 }
 0x15a   :  { %v176_v25 = vmul.f32 %v171_v24, %v149_v18  ;;  %v188_v31 = vmul.f32 %v171_v24, %v157_v16  ;;  %v754_v24 = vld [vmem:[%s914_s5 + $0x8] sm:$0xff]  }
 0x15b   :  { %v183_v29 = vpop.permute.xlu1 %182  ;;  %734 = vmatprep.subr.bf16.mxu0 %v754_v24 }
 0x15c   :  { %708 = vmatprep.mubr.msk.f32.mxu1 %vm192_vm0, %v176_v25  ;;  %v187_v30 = vmul.f32 %v183_v29, %v152_v22  ;;  %v191_v34 = vmul.f32 %v183_v29, %v160_v20  ;;  %735 = vmatpush3.bf16.msra.mxu0 %v754_v24  ;;  %v755_v25 = vld [vmem:[%s914_s5] sm:$0xff]  }
 0x15d   :  { %v173_v26 = vpop.permute.xlu0 %172  ;;  %736 = vmatprep.subr.bf16.mxu0 %v755_v25 }
 0x15e   :  { %v177_v27 = vmul.f32 %v173_v26, %v152_v22  ;;  %v189_v32 = vmul.f32 %v173_v26, %v160_v20 }
 0x15f   :  { %v503_v26 = vpop.permute.xlu1 %502 }
 0x160   :  { %709 = vmatmul.mubr.msk.f32.vlgmr.msra.gmra.mxu1 %vm192_vm0, %v177_v27  ;;  %737 = vmatpush3.bf16.msra.mxu0 %v755_v25 }
 0x161   :  { %711 = vmatprep.mubr.msk.f32.mxu1 %vm192_vm0, %v186_v28  ;;  %721 = vmatpush3.msk.msra.mxu1 %vm391_vm1, %v167_v35  ;;  %v501_v27 = vpop.permute.xlu0 %500 }
 0x164   :  { %712 = vmatmul.mubr.msk.f32.gmra.mxu1 %vm192_vm0, %v187_v30  ;;  %v511_v30 = vpop.permute.xlu1 %510 }
 0x165   :  { %714 = vmatprep.mubr.msk.f32.mxu1 %vm192_vm0, %v188_v31 }
 0x168   :  { %715 = vmatmul.mubr.msk.f32.gmra.mxu1 %vm192_vm0, %v189_v32 }
 0x169   :  { %717 = vmatprep.mubr.msk.f32.mxu1 %vm192_vm0, %v190_v33  ;;  %v509_v33 = vpop.permute.xlu0 %508 }
 0x16c   :  { %718 = vmatmul.mubr.msk.f32.gmra.mxu1 %vm192_vm0, %v191_v34 }
 0x220   :  { %v710_v36 = vpop.f32.mrf.mxu1 }
 0x222   :  { %v283_v37 = vpop.f32.mrf.mxu1 }
 0x224   :  { %v713_v38 = vpop.f32.mrf.mxu1 }
 0x225   :  { %v323_v39 = vmax.f32 %v710_v36, %v713_v38 }
 0x226   :  { %v293_v40 = vpop.f32.mrf.mxu1 }
 0x227   :  { %v325_v41 = vsub.f32 %v710_v36, %v323_v39  ;;  %v331_v42 = vsub.f32 %v713_v38, %v323_v39  ;;  %v322_v43 = vmax.f32 %v283_v37, %v293_v40 }
 0x228   :  { %v716_v44 = vpop.f32.mrf.mxu1 }
 0x229   :  { %v328_v45 = vmul.f32 1.442695, %v325_v41  ;;  %v334_v46 = vmul.f32 1.442695, %v331_v42  ;;  %v324_v47 = vsub.f32 %v283_v37, %v322_v43  ;;  %v330_v48 = vsub.f32 %v293_v40, %v322_v43 }
 0x22a   :  { %v303_v49 = vpop.f32.mrf.mxu1 }
 0x22b   :  { %756 = vpow2.f32 %v328_v45  ;;  %v326_v50 = vmul.f32 1.442695, %v324_v47  ;;  %v332_v51 = vmul.f32 1.442695, %v330_v48 }
 0x22c   :  { %758 = vpow2.f32 %v334_v46  ;;  %v719_v52 = vpop.f32.mrf.mxu1 }
 0x22d   :  { %760 = vpow2.f32 %v326_v50  ;;  %v345_v53 = vmax.f32 %v716_v44, %v719_v52 }
 0x22e   :  { %762 = vpow2.f32 %v332_v51  ;;  %v313_v54 = vpop.f32.mrf.mxu1 }
 0x22f   :  { %v347_v55 = vsub.f32 %v716_v44, %v345_v53  ;;  %v353_v56 = vsub.f32 %v719_v52, %v345_v53  ;;  %v344_v57 = vmax.f32 %v303_v49, %v313_v54  ;;  %v640_v52 = vld [vmem:[%s915_s6] ss:$0 sm:$0xff] }
 0x231   :  { %v350_v58 = vmul.f32 1.442695, %v347_v55  ;;  %v356_v59 = vmul.f32 1.442695, %v353_v56  ;;  %v346_v60 = vsub.f32 %v303_v49, %v344_v57  ;;  %v352_v61 = vsub.f32 %v313_v54, %v344_v57 }
 0x233   :  { %764 = vpow2.f32 %v350_v58  ;;  %v348_v62 = vmul.f32 1.442695, %v346_v60  ;;  %v354_v63 = vmul.f32 1.442695, %v352_v61 }
 0x234   :  { %766 = vpow2.f32 %v356_v59 }
 0x235   :  { %768 = vpow2.f32 %v348_v62 }
 0x236   :  { %770 = vpow2.f32 %v354_v63 }
 0x238   :  { %v757_v0 = vpop.eup %756 }
 0x239   :  { %v759_v1 = vpop.eup %758 }
 0x23a   :  { %v761_v2 = vpop.eup %760  ;;  %v337_v3 = vadd.f32 %v759_v1, %v757_v0 }
 0x23b   :  { %v763_v4 = vpop.eup %762 }
 0x23c   :  { %v336_v5 = vadd.f32 %v763_v4, %v761_v2  ;;  %772 = vrcp.f32 %v337_v3 }
 0x23e   :  { %774 = vrcp.f32 %v336_v5 }
 0x240   :  { %v765_v6 = vpop.eup %764 }
 0x241   :  { %v767_v7 = vpop.eup %766 }
 0x242   :  { %v769_v8 = vpop.eup %768  ;;  %v359_v9 = vadd.f32 %v767_v7, %v765_v6 }
 0x243   :  { %v771_v10 = vpop.eup %770 }
 0x244   :  { %v358_v11 = vadd.f32 %v771_v10, %v769_v8  ;;  %776 = vrcp.f32 %v359_v9 }
 0x246   :  { %778 = vrcp.f32 %v358_v11 }
 0x249   :  { %v773_v12 = vpop.eup %772 }
 0x24a   :  { %v341_v15 = vmul.f32 %v773_v12, %v757_v0  ;;  %v343_v17 = vmul.f32 %v773_v12, %v759_v1 }
 0x24b   :  { %v775_v13 = vpop.eup %774 }
 0x24c   :  { %v340_v14 = vmul.f32 %v775_v13, %v761_v2  ;;  %v342_v16 = vmul.f32 %v775_v13, %v763_v4 }
 0x24e   :  { %722 = vmatprep.mubr.msk.f32.mxu1 %vm366_vm2, %v340_v14 }
 0x24f   :  { %723 = vmatmul.mubr.msk.f32.vlgmr.msra.gmra.mxu1 %vm366_vm2, %v341_v15 }
 0x250   :  { %725 = vmatprep.mubr.msk.f32.mxu1 %vm366_vm2, %v342_v16 }
 0x251   :  { %v777_v18 = vpop.eup %776 }
 0x252   :  { %v363_v21 = vmul.f32 %v777_v18, %v765_v6  ;;  %v365_v23 = vmul.f32 %v777_v18, %v767_v7 }
 0x253   :  { %v779_v19 = vpop.eup %778  ;;  %726 = vmatmul.mubr.msk.f32.gmra.mxu1 %vm366_vm2, %v343_v17 }
 0x254   :  { %v362_v20 = vmul.f32 %v779_v19, %v769_v8  ;;  %v364_v22 = vmul.f32 %v779_v19, %v771_v10 }
 0x256   :  { %728 = vmatprep.mubr.msk.f32.mxu1 %vm366_vm2, %v362_v20 }
 0x257   :  { %729 = vmatmul.mubr.msk.f32.gmra.mxu1 %vm366_vm2, %v363_v21 }
 0x258   :  { %731 = vmatprep.mubr.msk.f32.mxu1 %vm366_vm2, %v364_v22 }
 0x25b   :  { %732 = vmatmul.mubr.msk.f32.gmra.mxu1 %vm366_vm2, %v365_v23 }
 0x30f   :  { %v724_v28 = vpop.f32.mrf.mxu1 }
 0x310   :  { %v507_v35 = vmul.f32 %v724_v28, %v503_v26 }
 0x311   :  { %v461_v29 = vpop.f32.mrf.mxu1 }
 0x312   :  { %v506_v36 = vmul.f32 %v501_v27, %v461_v29 }
 0x313   :  { %v727_v31 = vpop.f32.mrf.mxu1 }
 0x314   :  { %v515_v32 = vmul.f32 %v727_v31, %v511_v30 }
 0x315   :  { %v471_v34 = vpop.f32.mrf.mxu1 }
 0x316   :  { %v514_v37 = vmul.f32 %v509_v33, %v471_v34  ;;  %v517_v39 = vadd.f32 %v515_v32, %v507_v35 }
 0x317   :  { %v730_v38 = vpop.f32.mrf.mxu1 }
 0x318   :  { %v516_v40 = vadd.f32 %v514_v37, %v506_v36  ;;  %v519_v46 = vmul.f32 %v730_v38, %v503_v26 }
 0x319   :  { %v481_v41 = vpop.f32.mrf.mxu1 }
 0x31a   :  { %v524_v42 = vpack.c.bf16 %v517_v39, %v516_v40  ;;  %v518_v47 = vmul.f32 %v501_v27, %v481_v41 }
 0x31b   :  { %v733_v43 = vpop.f32.mrf.mxu1 }
 0x31c   :  { %v521_v44 = vmul.f32 %v733_v43, %v511_v30  ;;  %738 = vmatprep.mubr.msk.bf16.mxu0 %vm192_vm0, %v524_v42 }
 0x31d   :  { %v491_v45 = vpop.f32.mrf.mxu1 }
 0x31e   :  { %v520_v48 = vmul.f32 %v509_v33, %v491_v45  ;;  %v523_v49 = vadd.f32 %v521_v44, %v519_v46 }
 0x320   :  { %v522_v50 = vadd.f32 %v520_v48, %v518_v47 }
 0x322   :  { %v525_v51 = vpack.c.bf16 %v523_v49, %v522_v50 }
 0x324   :  { %739 = vmatmul.mubr.msk.bf16.vlgmr.msra.gmra.mxu0 %vm192_vm0, %v525_v51 }
 0x3e4   :  { %v740_v53 = vpop.f32.mrf.mxu0 }
 0x3e5   :  { %v598_v54 = vadd.f32 %v740_v53, %v640_v52 }
 0x3e6   :  { %v589_v55 = vpop.f32.mrf.mxu0 }
 0x3e7   :  { %606 = vst [vmem:[%s916_s7 + $0x10] sm:$0xff] %v598_v54  ;;  %v590_v56 = vadd.f32 %v640_v52, %v589_v55 }
 0x3e8   :  { %v741_v57 = vpop.f32.mrf.mxu0 }
 0x3e9   :  { %604 = vst [vmem:[%s916_s7] sm:$0xff] %v590_v56  ;;  %v601_v58 = vadd.f32 %v741_v57, %v640_v52 }
 0x3ea   :  { %v592_v59 = vpop.f32.mrf.mxu0 }
 0x3eb   :  { %607 = vst [vmem:[%s916_s7 + $0x18] sm:$0xff] %v601_v58  ;;  %v593_v60 = vadd.f32 %v640_v52, %v592_v59 }
 0x3ed   :  { %605 = vst [vmem:[%s916_s7 + $0x8] sm:$0xff] %v593_v60 }

// kernel: attention_block_forward.5
= control target key start
LH: loop header
LB: loop body
LE: loop exit
PB: predicated region body
PF: predicated region fallthrough
CT: control target
= control target key end

     0   :  { %s1761_s17 = smov 0   ;;  %s2489_s0 = inlined_call_operand.vmem [shape: f32[3,512], index: 0, kind: input, shape index: {}]   ;;  %s2490_s1 = inlined_call_operand.vmem [shape: f32[8,512], index: 1, kind: input, shape index: {}]   ;;  %s2491_s2 = inlined_call_operand.vmem [shape: f32[8,512], index: 2, kind: input, shape index: {}]   ;;  %s2492_s3 = inlined_call_operand.vmem [shape: f32[9,256], index: 3, kind: input, shape index: {}]   ;;  %s2493_s4 = inlined_call_operand.vmem [shape: f32[3,9], index: 4, kind: input, shape index: {}]   ;;  %s2494_s5 = inlined_call_operand.vmem [shape: f32[17,1], index: 5, kind: input, shape index: {}]   ;;  %s2495_s6 = inlined_call_operand.vmem [shape: f32[17,1], index: 6, kind: input, shape index: {}]   ;;  %s2496_s7 = inlined_call_operand.vmem [shape: bf16[8,153], index: 7, kind: input, shape index: {}]   ;;  %s2497_s8 = inlined_call_operand.vmem [shape: f32[8,1], index: 8, kind: input, shape index: {}]   ;;  %s2498_s9 = inlined_call_operand.vmem [shape: f32[8,256], index: 9, kind: input, shape index: {}]   ;;  %s2499_s10 = inlined_call_operand.vmem [shape: f32[8,256], index: 10, kind: input, shape index: {}]   ;;  %s2500_s11 = inlined_call_operand.vmem [shape: f32[8,512], index: 11, kind: output, shape index: {}]  }
   0x1 LB: > { %s1575_s18 = sadd.s32 4294967295, %s1681_s17   ;;  %p1579_p0 = scmp.ge.s32.totalorder %s1681_s17, 1  ;;  %s1681_s17 = sphi %s1761_s17, %s21_s17  }
   0x2   : > { %p360_p1 = scmp.lt.s32.totalorder %s1681_s17, 3 }
   0x4   : > { %p361_p2 = pnand %p1579_p0, %p360_p1 }
   0x5   : > { %s1580_s21 = sshll.u32 (!%p361_p2), %s1575_s18, 1  ;;  %s1686_s26 = smov (!%p361_p2), 17  }
   0x6   : > { %364 = sbr.rel (%p361_p2) target bundleno = 1412 (0x584), region = 64  ;;  %p411_p3 = scmp.lt.s32.totalorder (!%p361_p2), %s1580_s21, 3 }
   0x7   : > { %s1687_s27 = smov (!%p361_p2), 16   ;;  %s1689_s28 = smov (!%p361_p2), 15  }
   0x8   : > { %s1692_s29 = smov (!%p361_p2), 1   ;;  %s1693_s30 = smov (!%p361_p2), 127  }
   0x9   : > { %s1695_s12 = smov (!%p361_p2), 113   ;;  %s1698_s13 = smov (!%p361_p2), 112  }
   0xa   : > { %s2501_s14 = smov (!%p361_p2), 111  }
   0xb   : > { %v440_v0 = vld [vmem:[%s2493_s4] sm:$0x7]  ;;  %v1683_v1 = vmov 0   ;;  %v1684_v2 = vmov 2   ;;  %s2505_s21 = smov (!%p411_p3, %s1580_s21), 3  ;;  %v1685_v3 = vmov 1   ;;  %v448_v30 = vlaneseq }
   0xc   : > { %1623 = vset.pattern.permute.xlu0 %v1683_v1  ;;  %1625 = vset.pattern.permute.xlu1 %v1684_v2  ;;  %s1581_s22 = sshll.u32 %s2505_s21, 2  ;;  %v1688_v6 = vmov 3   ;;  %v1690_v7 = vmov 4   ;;  %v1691_v8 = vmov 5   ;;  %v1694_v9 = vmov 7   ;;  %s1807_s15 = sshll.u32 %s2505_s21, 3 }
   0xd   : > { %597 = vperm.xlu0 %1623, %v440_v0   ;;  %s414_s25 = scalar_lea.vmem %s2489_s0, %s1581_s22  ;;  %v1696_v10 = vmov 8   ;;  %v1697_v11 = vmov 6   ;;  %s420_s19 = scalar_lea.vmem %s2490_s1, %s1807_s15  ;;  %vm712_vm0 = vcmask 1040384   ;;  %v1845_v33 = vshrl.u32 %v448_v30, 7  ;;  %v1851_v37 = vld [vmem:[%s2492_s3] sm:$0xff]  ;;  %v1856_v38 = vld [vmem:[%s2492_s3 + $0x8] sm:$0xff] }
   0xe   : > { %v1778_v4 = vld [vmem:[%s414_s25] sm:$0x77]  ;;  %s426_s23 = scalar_lea.vmem %s2491_s2, %s1807_s15  ;;  %v1819_v13 = vld [vmem:[%s420_s19 + $0x8] sm:$0xff]  ;;  %v1868_v43 = vand.u32 127, %v448_v30  ;;  %vm669_vm9 = vcmask 1042432  }
   0xf   : > { %444 = vrot.lane.b32.xlu1 %v1778_v4, %s1686_s26  ;;  %v442_v5 = vcombine.high %v1778_v4, %v1778_v4  ;;  %v1817_v12 = vld [vmem:[%s420_s19] sm:$0xff]  ;;  %v699_v15 = vld [vmem:[%s426_s23 + $0x8] sm:$0xff]  ;;  %v703_v17 = vrot.slane %v1819_v13, 7  ;;  %v516_v36 = vsub.s32 4, %v1845_v33  ;;  %v455_v44 = vsub.s32 0, %v1845_v33 }
  0x10   : > { %v698_v14 = vld [vmem:[%s426_s23] sm:$0xff]  ;;  %v702_v16 = vrot.slane %v1817_v12, 7  ;;  %v1825_v19 = vrot.slane %v699_v15, 7  ;;  %v472_v45 = vsub.s32 1, %v1845_v33  ;;  %v489_v46 = vsub.s32 2, %v1845_v33 }
  0x11   : > { %1624 = vset.pattern.permute.xlu0 %v1685_v3  ;;  %v1823_v18 = vrot.slane %v698_v14, 7  ;;  %v1861_v40 = vrot.slane %v1851_v37, %v516_v36  ;;  %v1864_v41 = vrot.slane %v1856_v38, %v516_v36  ;;  %vm467_vm1 = vcmp.lt.s32.totalorder %v1868_v43, 16 }
  0x12   : > { %603 = vperm.xlu0 %1624, %v440_v0   ;;  %v1837_v21 = vsel %vm712_vm0, %v703_v17, %v1825_v19  ;;  %vm450_vm2 = vcmp.lt.s32.totalorder %v1868_v43, 17  ;;  %v1878_v49 = vrot.slane %v1851_v37, %v455_v44  ;;  %v1881_v50 = vrot.slane %v1851_v37, %v472_v45 }
  0x13   : > { %463 = vrot.lane.b32.xlu1 %v1778_v4, %s1687_s27  ;;  %v1831_v20 = vsel %vm712_vm0, %v702_v16, %v1823_v18  ;;  %v524_v47 = vcombine.low %v1861_v40, %v1864_v41  ;;  %v1884_v51 = vrot.slane %v1856_v38, %v472_v45  ;;  %vm484_vm3 = vcmp.lt.s32.totalorder %v1868_v43, 15 }
  0x14   : > { %v720_v22 = vadd.f32 %v1837_v21, %v1831_v20  ;;  %v506_v52 = vsub.s32 3, %v1845_v33  ;;  %v1889_v54 = vrot.slane %v1856_v38, %v455_v44  ;;  %v1896_v57 = vrot.slane %v1851_v37, %v489_v46 }
  0x15   : > { %v1899_v58 = vrot.slane %v1856_v38, %v489_v46  ;;  %vm501_vm4 = vcmp.lt.s32.totalorder %v1868_v43, 1  ;;  %v526_v59 = vmul.f32 %v524_v47, %v1778_v4  ;;  %v536_v60 = vsub.s32 5, %v1845_v33 }
  0x16   : > { %465 = vrot.lane.b32.xlu0 %v442_v5, %s1687_s27  ;;  %vm531_vm5 = vcmp.lt.s32.totalorder %v1868_v43, 127  ;;  %vm548_vm6 = vcmp.lt.s32.totalorder %v1868_v43, 113  ;;  %vm565_vm7 = vcmp.lt.s32.totalorder %v1868_v43, 112  ;;  %vm582_vm8 = vcmp.lt.s32.totalorder %v1868_v43, 111 }
  0x17   : > { %1626 = vset.pattern.permute.xlu0 %v1688_v6  ;;  %446 = vrot.lane.b32.xlu1 %v442_v5, %s1686_s26 }
  0x1a   : > { %480 = vrot.lane.b32.xlu0 %v1778_v4, %s1689_s28 }
  0x1b   : > { %611 = vperm.xlu1 %1625, %v440_v0  }
  0x1e   : > { %619 = vperm.xlu0 %1626, %v440_v0  }
  0x1f   : > { %482 = vrot.lane.b32.xlu1 %v442_v5, %s1689_s28 }
  0x20   : > { %1628 = vset.pattern.permute.xlu1 %v1691_v8  ;;  %v553_v8 = vsub.s32 6, %v1845_v33 }
  0x22   : > { %1627 = vset.pattern.permute.xlu0 %v1690_v7 }
  0x23   : > { %627 = vperm.xlu0 %1627, %v440_v0   ;;  %497 = vrot.lane.b32.xlu1 %v1778_v4, %s1692_s29 }
  0x27   : > { %529 = vrot.lane.b32.xlu0 %v442_v5, %s1693_s30  ;;  %499 = vrot.lane.b32.xlu1 %v442_v5, %s1692_s29 }
  0x28   : > { %1630 = vset.pattern.permute.xlu0 %v1694_v9 }
  0x2b   : > { %544 = vrot.lane.b32.xlu0 %v1778_v4, %s1695_s12  ;;  %638 = vperm.xlu1 %1628, %v440_v0  }
  0x2f   : > { %654 = vperm.xlu0 %1630, %v440_v0   ;;  %527 = vrot.lane.b32.xlu1 %v1778_v4, %s1693_s30 }
  0x30   : > { %1629 = vset.pattern.permute.xlu1 %v1697_v11 }
  0x33   : > { %1631 = vset.pattern.permute.xlu0 %v1696_v10  ;;  %646 = vperm.xlu1 %1629, %v440_v0  }
  0x34   : > { %662 = vperm.xlu0 %1631, %v440_v0  }
  0x37   : > { %546 = vrot.lane.b32.xlu1 %v442_v5, %s1695_s12 }
  0x38   : > { %1633 = vset.pattern.permute.xlu0 %v1683_v1  ;;  %1632 = vset.pattern.permute.xlu1 %v1683_v1 }
  0x3b   : > { %561 = vrot.lane.b32.xlu1 %v1778_v4, %s1698_s13 }
  0x3f   : > { %563 = vrot.lane.b32.xlu1 %v442_v5, %s1698_s13 }
  0x43   : > { %578 = vrot.lane.b32.xlu1 %v1778_v4, %s2501_s14  ;;  %v1917_v4 = vrot.slane %v1851_v37, %v506_v52 }
  0x47   : > { %580 = vrot.lane.b32.xlu1 %v442_v5, %s2501_s14  ;;  %v1920_v5 = vrot.slane %v1856_v38, %v506_v52 }
  0x6b   : > { %721 = vadd.xlane.f32.xlu1 %v720_v22 }
  0x81   : > { %v445_v23 = vpop.permute.xlu1 %444 }
  0x85   : > { %v464_v24 = vpop.permute.xlu1 %463 }
  0x88   : > { %v1841_v25 = vpop.permute.xlu0 %597 }
  0x89   : > { %v447_v26 = vpop.permute.xlu1 %446 }
  0x8a   : > { %v451_v62 = vsel %vm450_vm2, %v445_v23, %v447_v26  ;;  %v452_v63 = vsel %vm450_vm2, %v447_v26, %v445_v23  ;;  %v631_v23 = vcombine.high %v526_v59, %v526_v59 }
  0x8b   : > { %v461_v9 = vmul.f32 %v1878_v49, %v452_v63  ;;  %v462_v10 = vmul.f32 %v1889_v54, %v451_v62 }
  0x8d   : > { %v604_v28 = vpop.permute.xlu0 %603  ;;  %v600_v36 = vmul.f32 %v1841_v25, %v461_v9  ;;  %v601_v44 = vmul.f32 %v1841_v25, %v462_v10 }
  0x91   : > { %v466_v31 = vpop.permute.xlu0 %465 }
  0x92   : > { %v468_v55 = vsel %vm467_vm1, %v464_v24, %v466_v31  ;;  %v469_v56 = vsel %vm467_vm1, %v466_v31, %v464_v24  ;;  %v1933_v24 = vrot.slane %v1851_v37, %v536_v60 }
  0x93   : > { %v478_v2 = vmul.f32 %v1881_v50, %v469_v56  ;;  %v479_v3 = vmul.f32 %v1884_v51, %v468_v55  ;;  %v1954_v56 = vrot.slane %v1856_v38, %v553_v8 }
  0x95   : > { %v481_v34 = vpop.permute.xlu0 %480  ;;  %v606_v26 = vmul.f32 %v604_v28, %v478_v2 }
  0x96   : > { %v1843_v27 = vpop.permute.xlu1 %611 }
  0x99   : > { %v1858_v39 = vpop.permute.xlu0 %619 }
  0x9a   : > { %v483_v29 = vpop.permute.xlu1 %482 }
  0x9b   : > { %v485_v0 = vsel %vm484_vm3, %v481_v34, %v483_v29  ;;  %v486_v1 = vsel %vm484_vm3, %v483_v29, %v481_v34  ;;  %v607_v29 = vmul.f32 %v604_v28, %v479_v3  ;;  %v1942_v34 = vrot.slane %v1851_v37, %v553_v8 }
  0x9c   : > { %v495_v11 = vmul.f32 %v1896_v57, %v486_v1  ;;  %v496_v14 = vmul.f32 %v1899_v58, %v485_v0 }
  0x9e   : > { %v498_v32 = vpop.permute.xlu1 %497  ;;  %v628_v53 = vpop.permute.xlu0 %627  ;;  %v614_v28 = vmul.f32 %v1843_v27, %v495_v11  ;;  %v615_v45 = vmul.f32 %v1843_v27, %v496_v14 }
  0x9f   : > { %v634_v8 = vmul.f32 %v631_v23, %v628_v53 }
  0xa2   : > { %v500_v35 = vpop.permute.xlu1 %499  ;;  %v530_v15 = vpop.permute.xlu0 %529 }
  0xa3   : > { %v502_v6 = vsel %vm501_vm4, %v498_v32, %v500_v35  ;;  %v503_v7 = vsel %vm501_vm4, %v500_v35, %v498_v32  ;;  %v1938_v32 = vrot.slane %v1856_v38, %v536_v60  ;;  %v570_v35 = vsub.s32 7, %v1845_v33 }
  0xa4   : > { %v512_v30 = vmul.f32 %v1917_v4, %v503_v7  ;;  %v513_v31 = vmul.f32 %v1920_v5, %v502_v6  ;;  %v608_v33 = vadd.f32 %v606_v26, %v600_v36  ;;  %v609_v60 = vadd.f32 %v607_v29, %v601_v44  ;;  %v1588_v36 = vld [vmem:[%s2492_s3 + $0x10] ss:$0 sm:$0xff] }
  0xa5   : > { %v1964_v0 = vrot.slane %v1851_v37, %v570_v35 }
  0xa6   : > { %v1866_v42 = vpop.permute.xlu1 %638  ;;  %v545_v46 = vpop.permute.xlu0 %544  ;;  %v622_v25 = vmul.f32 %v1858_v39, %v512_v30  ;;  %v623_v62 = vmul.f32 %v1858_v39, %v513_v31  ;;  %v616_v1 = vadd.f32 %v614_v28, %v608_v33  ;;  %v617_v2 = vadd.f32 %v615_v45, %v609_v60 }
  0xa7   : > { %v633_v39 = vmul.f32 %v628_v53, %v526_v59 }
  0xa8   : > { %v624_v37 = vadd.f32 %v622_v25, %v616_v1  ;;  %v625_v11 = vadd.f32 %v623_v62, %v617_v2 }
  0xaa   : > { %v528_v48 = vpop.permute.xlu1 %527  ;;  %v655_v23 = vpop.permute.xlu0 %654  ;;  %v635_v29 = vadd.f32 %v633_v39, %v624_v37  ;;  %v636_v30 = vadd.f32 %v634_v8, %v625_v11 }
  0xab   : > { %v532_v52 = vsel %vm531_vm5, %v528_v48, %v530_v15  ;;  %v533_v55 = vsel %vm531_vm5, %v530_v15, %v528_v48  ;;  %v1967_v48 = vrot.slane %v1856_v38, %v570_v35 }
  0xac   : > { %v542_v3 = vmul.f32 %v1933_v24, %v532_v52  ;;  %v543_v6 = vmul.f32 %v1938_v32, %v533_v55 }
  0xae   : > { %v1904_v61 = vpop.permute.xlu1 %646  ;;  %v641_v15 = vmul.f32 %v1866_v42, %v542_v3 }
  0xb0   : > { %v643_v44 = vadd.f32 %v641_v15, %v635_v29 }
  0xb2   : > { %v547_v22 = vpop.permute.xlu1 %546 }
  0xb3   : > { %v549_v27 = vsel %vm548_vm6, %v545_v46, %v547_v22  ;;  %v550_v63 = vsel %vm548_vm6, %v547_v22, %v545_v46  ;;  %v642_v22 = vmul.f32 %v1866_v42, %v543_v6  ;;  %v1589_v42 = vld [vmem:[%s2492_s3 + $0x18] ss:$0 sm:$0xff] }
  0xb4   : > { %v559_v38 = vmul.f32 %v1942_v34, %v549_v27  ;;  %v560_v14 = vmul.f32 %v1954_v56, %v550_v63 }
  0xb5   : > { %v644_v28 = vadd.f32 %v642_v22, %v636_v30 }
  0xb6   : > { %v562_v47 = vpop.permute.xlu1 %561  ;;  %v649_v31 = vmul.f32 %v1904_v61, %v559_v38  ;;  %v650_v35 = vmul.f32 %v1904_v61, %v560_v14  ;;  %v663_v61 = vpop.permute.xlu0 %662 }
  0xb8   : > { %v651_v33 = vadd.f32 %v649_v31, %v643_v44  ;;  %v652_v60 = vadd.f32 %v650_v35, %v644_v28 }
  0xba   : > { %v564_v7 = vpop.permute.xlu1 %563 }
  0xbb   : > { %v566_v9 = vsel %vm565_vm7, %v562_v47, %v564_v7  ;;  %v567_v10 = vsel %vm565_vm7, %v564_v7, %v562_v47 }
  0xbc   : > { %v576_v26 = vmul.f32 %v1964_v0, %v566_v9  ;;  %v577_v53 = vmul.f32 %v1967_v48, %v567_v10 }
  0xbe   : > { %v579_v59 = vpop.permute.xlu1 %578  ;;  %v657_v45 = vmul.f32 %v655_v23, %v576_v26  ;;  %v658_v46 = vmul.f32 %v655_v23, %v577_v53 }
  0xc0   : > { %v659_v27 = vadd.f32 %v657_v45, %v651_v33  ;;  %v660_v63 = vadd.f32 %v658_v46, %v652_v60  ;;  %v723_v46 = vsel %vm712_vm0, %v1823_v18, 0.0 }
  0xc2   : > { %v581_v47 = vpop.permute.xlu1 %580 }
  0xc3   : > { %v583_v52 = vsel %vm582_vm8, %v579_v59, %v581_v47  ;;  %v584_v55 = vsel %vm582_vm8, %v581_v47, %v579_v59  ;;  %v724_v47 = vsel %vm712_vm0, %v1825_v19, 0.0 }
  0xc4   : > { %v593_v25 = vmul.f32 %v1588_v36, %v583_v52  ;;  %v594_v62 = vmul.f32 %v1589_v42, %v584_v55  ;;  %v725_v55 = vadd.f32 %v724_v47, %v723_v46 }
  0xc6   : > { %v665_v1 = vmul.f32 %v663_v61, %v593_v25  ;;  %v666_v2 = vmul.f32 %v663_v61, %v594_v62 }
  0xc8   : > { %v667_v3 = vadd.f32 %v665_v1, %v659_v27  ;;  %v668_v6 = vadd.f32 %v666_v2, %v660_v63 }
  0xca   : > { %v670_v7 = vsel %vm669_vm9, %v667_v3, 0.0  ;;  %v677_v39 = vsel %vm669_vm9, %v668_v6, 0.0 }
  0xcb   : > { %v671_v8 = vrot.slane %v670_v7, 4  ;;  %v678_v9 = vrot.slane %v677_v39, 4 }
  0xcd   : > { %v672_v10 = vadd.f32 %v671_v8, %v670_v7  ;;  %v679_v37 = vadd.f32 %v678_v9, %v677_v39 }
  0xcf   : > { %v673_v11 = vrot.slane %v672_v10, 2  ;;  %v680_v38 = vrot.slane %v679_v37, 2 }
  0xd1   : > { %v674_v14 = vadd.f32 %v673_v11, %v672_v10  ;;  %v681_v15 = vadd.f32 %v680_v38, %v679_v37 }
  0xd3   : > { %v675_v22 = vrot.slane %v674_v14, 1  ;;  %v682_v26 = vrot.slane %v681_v15, 1 }
  0xd5   : > { %v676_v53 = vadd.f32 %v675_v22, %v674_v14  ;;  %v683_v59 = vadd.f32 %v682_v26, %v681_v15 }
  0xd7   : > { %v1590_v23 = vmul.f32 -1.442695, %v676_v53  ;;  %v1591_v29 = vmul.f32 -1.442695, %v683_v59 }
  0xd9   : > { %1637 = vpow2.f32 %v1590_v23 }
  0xda   : > { %1639 = vpow2.f32 %v1591_v29 }
  0xe6   : > { %v1638_v30 = vpop.eup %1637 }
  0xe7   : > { %v1640_v31 = vpop.eup %1639  ;;  %v690_v35 = vadd.f32 1.0, %v1638_v30  ;;  %v812_v30 = vld [vmem:[%s2495_s6 + $0x8] sm:$0xff] }
  0xe8   : > { %v691_v36 = vadd.f32 1.0, %v1640_v31  ;;  %v789_v31 = vld [vmem:[%s2494_s5 + $0x10] sm:$0x1] }
  0xe9   : > { %1641 = vrcp.f32 %v690_v35  ;;  %v813_v35 = vld [vmem:[%s2495_s6 + $0x10] sm:$0x1] }
  0xea   : > { %1643 = vrcp.f32 %v691_v36  ;;  %v811_v36 = vld [vmem:[%s2495_s6] sm:$0xff] }
  0xf4   : > { %v722_v61 = vpop.xlane.xlu1 %721 }
  0xf5   : > { %v730_v12 = vmul.f32 0.00390625, %v722_v61 }
  0xf6   : > { %v1642_v42 = vpop.eup %1641 }
  0xf7   : > { %v1644_v44 = vpop.eup %1643  ;;  %v713_v28 = vsel %vm712_vm0, %v1642_v42, %v702_v16 }
  0xf8   : > { %v714_v45 = vsel %vm712_vm0, %v1644_v44, %v703_v17 }
  0xf9   : > { %v717_v52 = vadd.f32 %v714_v45, %v713_v28 }
  0xfb   : > { %718 = vadd.xlane.f32.xlu0 %v717_v52 }
  0xff   : > { %726 = vadd.xlane.f32.xlu0 %v725_v55 }
 0x184   : > { %v719_v33 = vpop.xlane.xlu0 %718 }
 0x185   : > { %v729_v60 = vmul.f32 0.00390625, %v719_v33 }
 0x187   : > { %v732_v62 = vadd.f32 %v730_v12, %v729_v60 }
 0x188   : > { %v727_v25 = vpop.xlane.xlu0 %726 }
 0x189   : > { %v731_v16 = vmul.f32 0.00390625, %v727_v25 }
 0x18b   : > { %v733_v13 = vsel %vm712_vm0, %v731_v16, 0.0 }
 0x18c   : > { %v734_v17 = vadd.f32 %v733_v13, %v732_v62 }
 0x18e   : > { %v735_v27 = vrot.slane %v734_v17, 4 }
 0x190   : > { %v736_v63 = vadd.f32 %v735_v27, %v734_v17 }
 0x192   : > { %v737_v1 = vrot.slane %v736_v63, 2 }
 0x194   : > { %v738_v2 = vadd.f32 %v737_v1, %v736_v63 }
 0x196   : > { %v739_v3 = vrot.slane %v738_v2, 1 }
 0x198   : > { %v740_v6 = vadd.f32 %v739_v3, %v738_v2 }
 0x19a   : > { %v742_v7 = vmul.f32 0.05882353, %v740_v6 }
 0x19c   : > { %v745_v39 = vsub.f32 %v1831_v20, %v742_v7  ;;  %v746_v8 = vsub.f32 %v1837_v21, %v742_v7  ;;  %v743_v9 = vsub.f32 %v713_v28, %v742_v7  ;;  %v744_v10 = vsub.f32 %v714_v45, %v742_v7 }
 0x19d   : > { %v747_v37 = vsub.f32 %v1823_v18, %v742_v7  ;;  %v748_v11 = vsub.f32 %v1825_v19, %v742_v7  ;;  %v788_v18 = vld [vmem:[%s2494_s5 + $0x8] sm:$0xff]  ;;  %v787_v19 = vld [vmem:[%s2494_s5] sm:$0xff] }
 0x19e   : > { %v751_v38 = vmul.f32 %v745_v39, %v745_v39  ;;  %v752_v14 = vmul.f32 %v746_v8, %v746_v8  ;;  %v749_v15 = vmul.f32 %v743_v9, %v743_v9  ;;  %v750_v22 = vmul.f32 %v744_v10, %v744_v10 }
 0x19f   : > { %v753_v26 = vmul.f32 %v747_v37, %v747_v37  ;;  %v754_v53 = vmul.f32 %v748_v11, %v748_v11 }
 0x1a0   : > { %v758_v59 = vadd.f32 %v752_v14, %v751_v38  ;;  %v755_v23 = vadd.f32 %v750_v22, %v749_v15 }
 0x1a1   : > { %v761_v29 = vsel %vm712_vm0, %v753_v26, 0.0  ;;  %v762_v20 = vsel %vm712_vm0, %v754_v53, 0.0 }
 0x1a2   : > { %759 = vadd.xlane.f32.xlu1 %v758_v59  ;;  %756 = vadd.xlane.f32.xlu0 %v755_v23  ;;  %v763_v21 = vadd.f32 %v762_v20, %v761_v29 }
 0x1a6   : > { %764 = vadd.xlane.f32.xlu0 %v763_v21 }
 0x1b3   : > { %797 = vperm.xlu1 %1632, %v788_v18  }
 0x1b7   : > { %792 = vperm.xlu1 %1632, %v787_v19  }
 0x1bb   : > { %821 = vperm.xlu1 %1632, %v812_v30  }
 0x1bc   : > { %802 = vperm.xlu0 %1633, %v789_v31  }
 0x1bf   : > { %826 = vperm.xlu1 %1632, %v813_v35  }
 0x1c3   : > { %816 = vperm.xlu1 %1632, %v811_v36  }
 0x22b   : > { %v760_v42 = vpop.xlane.xlu1 %759  ;;  %v757_v44 = vpop.xlane.xlu0 %756 }
 0x22c   : > { %v767_v28 = vmul.f32 0.00390625, %v760_v42  ;;  %v766_v45 = vmul.f32 0.00390625, %v757_v44 }
 0x22e   : > { %v769_v52 = vadd.f32 %v767_v28, %v766_v45 }
 0x22f   : > { %v765_v46 = vpop.xlane.xlu0 %764  ;;  %v798_v62 = vpop.permute.xlu1 %797 }
 0x230   : > { %v768_v47 = vmul.f32 0.00390625, %v765_v46 }
 0x232   : > { %v770_v55 = vsel %vm712_vm0, %v768_v47, 0.0 }
 0x233   : > { %v771_v61 = vadd.f32 %v770_v55, %v769_v52  ;;  %v793_v63 = vpop.permute.xlu1 %792 }
 0x235   : > { %v772_v33 = vrot.slane %v771_v61, 4 }
 0x237   : > { %v773_v60 = vadd.f32 %v772_v33, %v771_v61  ;;  %v822_v1 = vpop.permute.xlu1 %821  ;;  %v803_v20 = vpop.permute.xlu0 %802 }
 0x239   : > { %v774_v12 = vrot.slane %v773_v60, 2 }
 0x23b   : > { %v775_v25 = vadd.f32 %v774_v12, %v773_v60  ;;  %v827_v2 = vpop.permute.xlu1 %826 }
 0x23d   : > { %v776_v16 = vrot.slane %v775_v25, 1 }
 0x23f   : > { %v777_v13 = vadd.f32 %v776_v16, %v775_v25  ;;  %v817_v23 = vpop.permute.xlu1 %816 }
 0x241   : > { %v778_v17 = vmul.f32 0.05882353, %v777_v13 }
 0x243   : > { %v779_v27 = vadd.f32 1e-05, %v778_v17 }
 0x245   : > { %1645 = vrsqrt.f32 %v779_v27 }
 0x252   : > { %v1646_v3 = vpop.eup %1645 }
 0x253   : > { %v783_v6 = vmul.f32 %v1646_v3, %v745_v39  ;;  %v784_v7 = vmul.f32 %v1646_v3, %v746_v8  ;;  %v781_v38 = vmul.f32 %v1646_v3, %v743_v9  ;;  %v782_v14 = vmul.f32 %v1646_v3, %v744_v10 }
 0x254   : > { %v785_v15 = vmul.f32 %v1646_v3, %v747_v37  ;;  %v786_v29 = vmul.f32 %v1646_v3, %v748_v11 }
 0x255   : > { %v807_v22 = vmul.f32 %v798_v62, %v783_v6  ;;  %v808_v26 = vmul.f32 %v798_v62, %v784_v7  ;;  %v805_v53 = vmul.f32 %v793_v63, %v781_v38  ;;  %v806_v59 = vmul.f32 %v793_v63, %v782_v14 }
 0x256   : > { %v809_v9 = vmul.f32 %v803_v20, %v785_v15  ;;  %v810_v11 = vmul.f32 %v803_v20, %v786_v29 }
 0x257   : > { %v2032_v21 = vadd.f32 %v822_v1, %v807_v22  ;;  %v2034_v18 = vadd.f32 %v822_v1, %v808_v26  ;;  %v2036_v19 = vadd.f32 %v817_v23, %v805_v53  ;;  %v2038_v30 = vadd.f32 %v817_v23, %v806_v59 }
 0x258   : > { %v2056_v45 = vadd.f32 %v827_v2, %v809_v9  ;;  %v2058_v52 = vadd.f32 %v827_v2, %v810_v11 }
 0x259   : > { %v2041_v39 = vmul.f32 0.70710677, %v2032_v21  ;;  %v2044_v8 = vmul.f32 0.70710677, %v2034_v18  ;;  %v2047_v10 = vmul.f32 0.70710677, %v2036_v19 }
 0x25a   : > { %v2050_v37 = vmul.f32 0.70710677, %v2038_v30  ;;  %v2061_v60 = vmul.f32 0.70710677, %v2056_v45  ;;  %v2064_v25 = vmul.f32 0.70710677, %v2058_v52 }
 0x25b   : > { %v843_v31 = vand.u32 2147483647, %v2041_v39  ;;  %v844_v35 = vand.u32 2147483647, %v2044_v8  ;;  %v841_v36 = vand.u32 2147483647, %v2047_v10 }
 0x25c   : > { %v842_v42 = vand.u32 2147483647, %v2050_v37  ;;  %v845_v16 = vand.u32 2147483647, %v2061_v60  ;;  %v846_v62 = vand.u32 2147483647, %v2064_v25 }
 0x25d   : > { %v849_v44 = vmul.f32 0.3275911, %v843_v31  ;;  %v850_v28 = vmul.f32 0.3275911, %v844_v35  ;;  %v847_v46 = vmul.f32 0.3275911, %v841_v36 }
 0x25e   : > { %v848_v47 = vmul.f32 0.3275911, %v842_v42  ;;  %v851_v13 = vmul.f32 0.3275911, %v845_v16  ;;  %v852_v17 = vmul.f32 0.3275911, %v846_v62 }
 0x25f   : > { %v855_v55 = vadd.f32 1.0, %v849_v44  ;;  %v856_v61 = vadd.f32 1.0, %v850_v28  ;;  %v853_v33 = vadd.f32 1.0, %v847_v46  ;;  %v927_v27 = vsub.f32 0.0, %v843_v31 }
 0x260   : > { %v854_v12 = vadd.f32 1.0, %v848_v47  ;;  %v857_v63 = vadd.f32 1.0, %v851_v13  ;;  %v928_v1 = vsub.f32 0.0, %v844_v35  ;;  %v858_v2 = vadd.f32 1.0, %v852_v17 }
 0x261   : > { %1647 = vrcp.f32 %v855_v55  ;;  %v925_v3 = vsub.f32 0.0, %v841_v36  ;;  %v926_v6 = vsub.f32 0.0, %v842_v42  ;;  %v933_v7 = vmul.f32 %v927_v27, %v843_v31 }
 0x262   : > { %1649 = vrcp.f32 %v856_v61  ;;  %v934_v38 = vmul.f32 %v928_v1, %v844_v35  ;;  %v929_v23 = vsub.f32 0.0, %v845_v16  ;;  %v930_v9 = vsub.f32 0.0, %v846_v62 }
 0x263   : > { %1651 = vrcp.f32 %v853_v33  ;;  %v931_v14 = vmul.f32 %v925_v3, %v841_v36  ;;  %v932_v22 = vmul.f32 %v926_v6, %v842_v42  ;;  %v941_v59 = vmul.f32 1.442695, %v933_v7 }
 0x264   : > { %1653 = vrcp.f32 %v854_v12  ;;  %v943_v20 = vmul.f32 1.442695, %v934_v38  ;;  %v935_v36 = vmul.f32 %v929_v23, %v845_v16  ;;  %v936_v33 = vmul.f32 %v930_v9, %v846_v62 }
 0x265   : > { %1655 = vrcp.f32 %v857_v63  ;;  %v937_v44 = vmul.f32 1.442695, %v931_v14  ;;  %v939_v47 = vmul.f32 1.442695, %v932_v22  ;;  %vm963_vm10 = vcmp.lt.f32.partialorder %v2041_v39, 0.0 }
 0x266   : > { %1657 = vrcp.f32 %v858_v2  ;;  %v945_v6 = vmul.f32 1.442695, %v935_v36  ;;  %v947_v14 = vmul.f32 1.442695, %v936_v33  ;;  %vm961_vm11 = vcmp.lt.f32.partialorder %v2047_v10, 0.0 }
 0x267   : > { %1659 = vpow2.f32 %v941_v59  ;;  %vm962_vm12 = vcmp.lt.f32.partialorder %v2050_v37, 0.0  ;;  %vm964_vm13 = vcmp.lt.f32.partialorder %v2044_v8, 0.0  ;;  %vm965_vm14 = vcmp.lt.f32.partialorder %v2061_v60, 0.0 }
 0x268   : > { %1661 = vpow2.f32 %v943_v20  ;;  %vm966_vm15 = vcmp.lt.f32.partialorder %v2064_v25, 0.0  ;;  %v982_v60 = vmul.f32 0.5, %v2034_v18  ;;  %v1389_v18 = vld [vmem:[%s2497_s8] sm:$0xff] }
 0x269   : > { %1663 = vpow2.f32 %v937_v44 }
 0x26a   : > { %1665 = vpow2.f32 %v939_v47 }
 0x26b   : > { %1667 = vpow2.f32 %v945_v6 }
 0x26c   : > { %1669 = vpow2.f32 %v947_v14 }
 0x26e   : > { %v1648_v15 = vpop.eup %1647 }
 0x26f   : > { %v1650_v26 = vpop.eup %1649  ;;  %v873_v53 = vmul.f32 1.0614054, %v1648_v15 }
 0x270   : > { %v874_v29 = vmul.f32 1.0614054, %v1650_v26  ;;  %v2068_v28 = vpop.eup %1651 }
 0x271   : > { %v879_v11 = vadd.f32 -1.4531521, %v873_v53  ;;  %v2070_v55 = vpop.eup %1653  ;;  %v871_v35 = vmul.f32 1.0614054, %v2068_v28 }
 0x272   : > { %v880_v46 = vadd.f32 -1.4531521, %v874_v29  ;;  %v872_v61 = vmul.f32 1.0614054, %v2070_v55  ;;  %v2074_v17 = vpop.eup %1655 }
 0x273   : > { %v885_v31 = vmul.f32 %v1648_v15, %v879_v11  ;;  %v877_v13 = vadd.f32 -1.4531521, %v871_v35  ;;  %v2076_v1 = vpop.eup %1657  ;;  %v875_v16 = vmul.f32 1.0614054, %v2074_v17 }
 0x274   : > { %v886_v42 = vmul.f32 %v1650_v26, %v880_v46  ;;  %v878_v63 = vadd.f32 -1.4531521, %v872_v61  ;;  %v876_v62 = vmul.f32 1.0614054, %v2076_v1 }
 0x275   : > { %v891_v12 = vadd.f32 1.4214138, %v885_v31  ;;  %v883_v3 = vmul.f32 %v2068_v28, %v877_v13  ;;  %v881_v59 = vadd.f32 -1.4531521, %v875_v16 }
 0x276   : > { %v892_v27 = vadd.f32 1.4214138, %v886_v42  ;;  %v884_v38 = vmul.f32 %v2070_v55, %v878_v63  ;;  %v882_v20 = vadd.f32 -1.4531521, %v876_v62 }
 0x277   : > { %v897_v2 = vmul.f32 %v1648_v15, %v891_v12  ;;  %v889_v53 = vadd.f32 1.4214138, %v883_v3  ;;  %v887_v44 = vmul.f32 %v2074_v17, %v881_v59 }
 0x278   : > { %v898_v7 = vmul.f32 %v1650_v26, %v892_v27  ;;  %v890_v29 = vadd.f32 1.4214138, %v884_v38  ;;  %v888_v31 = vmul.f32 %v2076_v1, %v882_v20 }
 0x279   : > { %v903_v22 = vadd.f32 -0.28449672, %v897_v2  ;;  %v895_v11 = vmul.f32 %v2068_v28, %v889_v53  ;;  %v893_v42 = vadd.f32 1.4214138, %v887_v44  ;;  %v1660_v2 = vpop.eup %1659 }
 0x27a   : > { %v904_v23 = vadd.f32 -0.28449672, %v898_v7  ;;  %v896_v47 = vmul.f32 %v2070_v55, %v890_v29  ;;  %v894_v12 = vadd.f32 1.4214138, %v888_v31  ;;  %v1662_v7 = vpop.eup %1661 }
 0x27b   : > { %v909_v9 = vmul.f32 %v1648_v15, %v903_v22  ;;  %v901_v36 = vadd.f32 -0.28449672, %v895_v11  ;;  %v899_v63 = vmul.f32 %v2074_v17, %v893_v42  ;;  %v1664_v22 = vpop.eup %1663 }
 0x27c   : > { %v910_v46 = vmul.f32 %v1650_v26, %v904_v23  ;;  %v902_v33 = vadd.f32 -0.28449672, %v896_v47  ;;  %v900_v6 = vmul.f32 %v2076_v1, %v894_v12  ;;  %v1666_v23 = vpop.eup %1665 }
 0x27d   : > { %v915_v35 = vadd.f32 0.2548296, %v909_v9  ;;  %v907_v27 = vmul.f32 %v2068_v28, %v901_v36  ;;  %v905_v14 = vadd.f32 -0.28449672, %v899_v63  ;;  %v1668_v12 = vpop.eup %1667 }
 0x27e   : > { %v916_v61 = vadd.f32 0.2548296, %v910_v46  ;;  %v908_v16 = vmul.f32 %v2070_v55, %v902_v33  ;;  %v906_v59 = vadd.f32 -0.28449672, %v900_v6  ;;  %v1670_v63 = vpop.eup %1669 }
 0x27f   : > { %v921_v13 = vmul.f32 %v1648_v15, %v915_v35  ;;  %v913_v62 = vadd.f32 0.2548296, %v907_v27  ;;  %v911_v9 = vmul.f32 %v2074_v17, %v905_v14 }
 0x280   : > { %v922_v3 = vmul.f32 %v1650_v26, %v916_v61  ;;  %v914_v53 = vadd.f32 0.2548296, %v908_v16  ;;  %v912_v11 = vmul.f32 %v2076_v1, %v906_v59 }
 0x281   : > { %v951_v38 = vmul.f32 %v1660_v2, %v921_v13  ;;  %v919_v20 = vmul.f32 %v2068_v28, %v913_v62  ;;  %v917_v47 = vadd.f32 0.2548296, %v911_v9  ;;  %v981_v28 = vmul.f32 0.5, %v2032_v21 }
 0x282   : > { %v952_v29 = vmul.f32 %v1662_v7, %v922_v3  ;;  %v920_v26 = vmul.f32 %v2070_v55, %v914_v53  ;;  %v918_v35 = vadd.f32 0.2548296, %v912_v11  ;;  %v979_v21 = vmul.f32 0.5, %v2036_v19 }
 0x283   : > { %v957_v15 = vsub.f32 1.0, %v951_v38  ;;  %v949_v46 = vmul.f32 %v1664_v22, %v919_v20  ;;  %v923_v33 = vmul.f32 %v2074_v17, %v917_v47  ;;  %v983_v19 = vmul.f32 0.5, %v2056_v45 }
 0x284   : > { %v950_v31 = vmul.f32 %v1666_v23, %v920_v26  ;;  %v958_v36 = vsub.f32 1.0, %v952_v29  ;;  %v924_v55 = vmul.f32 %v2076_v1, %v918_v35  ;;  %v980_v29 = vmul.f32 0.5, %v2038_v30 }
 0x285   : > { %v969_v44 = vsub.f32 0.0, %v957_v15  ;;  %v955_v61 = vsub.f32 1.0, %v949_v46  ;;  %v953_v3 = vmul.f32 %v1668_v12, %v923_v33  ;;  %v984_v11 = vmul.f32 0.5, %v2058_v52  ;;  %v2218_v52 = vld [vmem:[%s2496_s7] sm:$0xff] }
 0x286   : > { %v956_v27 = vsub.f32 1.0, %v950_v31  ;;  %v954_v6 = vmul.f32 %v1670_v63, %v924_v55  ;;  %v970_v7 = vsub.f32 0.0, %v958_v36 }
 0x287   : > { %v975_v42 = vsel %vm963_vm10, %v969_v44, %v957_v15  ;;  %v967_v2 = vsub.f32 0.0, %v955_v61  ;;  %v959_v38 = vsub.f32 1.0, %v953_v3  ;;  %vm1401_vm10 = vcmask 203776  }
 0x288   : > { %v987_v13 = vadd.f32 1.0, %v975_v42  ;;  %v968_v39 = vsub.f32 0.0, %v956_v27  ;;  %v960_v22 = vsub.f32 1.0, %v954_v6  ;;  %v976_v59 = vsel %vm964_vm13, %v970_v7, %v958_v36 }
 0x289   : > { %v973_v17 = vsel %vm961_vm11, %v967_v2, %v955_v61  ;;  %v971_v1 = vsub.f32 0.0, %v959_v38  ;;  %v988_v20 = vadd.f32 1.0, %v976_v59  ;;  %v1593_v44 = vcombine.high %v2218_v52, %v2218_v52 }
 0x28a   : > { %v2098_v16 = vmul.f32 %v987_v13, %v981_v28  ;;  %v974_v62 = vsel %vm962_vm12, %v968_v39, %v956_v27  ;;  %v985_v14 = vadd.f32 1.0, %v973_v17  ;;  %v972_v37 = vsub.f32 0.0, %v960_v22 }
 0x28b   : > { %v986_v53 = vadd.f32 1.0, %v974_v62  ;;  %v977_v23 = vsel %vm965_vm14, %v971_v1, %v959_v38  ;;  %v2123_v30 = vmul.f32 %v988_v20, %v982_v60  ;;  %1594 = vmatprep.mubr.msk.bf16.mxu0 %vm1401_vm10, %v1593_v44  ;;  %vm1314_vm11 = vcmask 1045504  }
 0x28c   : > { %1125 = vrot.lane.b32.xlu1 %v2098_v16, %s1695_s12  ;;  %v2106_v10 = vmul.f32 %v985_v14, %v979_v21  ;;  %v989_v15 = vadd.f32 1.0, %v977_v23  ;;  %v978_v26 = vsel %vm966_vm15, %v972_v37, %v960_v22  ;;  %vm1337_vm12 = vcmask 1046528  }
 0x28d   : > { %v2113_v9 = vmul.f32 %v986_v53, %v980_v29  ;;  %v990_v45 = vadd.f32 1.0, %v978_v26  ;;  %vm1291_vm13 = vcmask 1044480  }
 0x28e   : > { %1147 = vrot.lane.b32.xlu0 %v2106_v10, %s1698_s13  ;;  %v2116_v8 = vmul.f32 %v989_v15, %v983_v19 }
 0x28f   : > { %v2130_v25 = vmul.f32 %v990_v45, %v984_v11 }
 0x290   : > { %1127 = vrot.lane.b32.xlu1 %v2116_v8, %s1695_s12 }
 0x292   : > { %1153 = vrot.lane.b32.xlu0 %v2113_v9, %s1698_s13 }
 0x294   : > { %1131 = vrot.lane.b32.xlu1 %v2123_v30, %s1695_s12 }
 0x296   : > { %1101 = vrot.lane.b32.xlu0 %v2098_v16, %s1693_s30 }
 0x298   : > { %1133 = vrot.lane.b32.xlu1 %v2130_v25, %s1695_s12 }
 0x29a   : > { %1107 = vrot.lane.b32.xlu0 %v2123_v30, %s1693_s30 }
 0x29c   : > { %1149 = vrot.lane.b32.xlu1 %v2098_v16, %s1698_s13 }
 0x29e   : > { %1123 = vrot.lane.b32.xlu0 %v2106_v10, %s1695_s12 }
 0x2a0   : > { %1155 = vrot.lane.b32.xlu1 %v2123_v30, %s1698_s13 }
 0x2a2   : > { %1099 = vrot.lane.b32.xlu0 %v2106_v10, %s1693_s30 }
 0x2a4   : > { %1103 = vrot.lane.b32.xlu1 %v2116_v8, %s1693_s30 }
 0x2a6   : > { %1071 = vrot.lane.b32.xlu0 %v2098_v16, %s1692_s29 }
 0x2a8   : > { %1109 = vrot.lane.b32.xlu1 %v2130_v25, %s1693_s30 }
 0x2aa   : > { %1077 = vrot.lane.b32.xlu0 %v2123_v30, %s1692_s29 }
 0x2ac   : > { %1129 = vrot.lane.b32.xlu1 %v2113_v9, %s1695_s12 }
 0x2ae   : > { %1047 = vrot.lane.b32.xlu0 %v2098_v16, %s1689_s28 }
 0x2b0   : > { %1105 = vrot.lane.b32.xlu1 %v2113_v9, %s1693_s30  ;;  %s2503_s30 = smov 111  }
 0x2b2   : > { %1053 = vrot.lane.b32.xlu0 %v2123_v30, %s1689_s28 }
 0x2b4   : > { %1073 = vrot.lane.b32.xlu1 %v2116_v8, %s1692_s29 }
 0x2b6   : > { %1069 = vrot.lane.b32.xlu0 %v2106_v10, %s1692_s29 }
 0x2b8   : > { %1079 = vrot.lane.b32.xlu1 %v2130_v25, %s1692_s29 }
 0x2ba   : > { %1023 = vrot.lane.b32.xlu0 %v2098_v16, %s1687_s27 }
 0x2bc   : > { %1049 = vrot.lane.b32.xlu1 %v2116_v8, %s1689_s28 }
 0x2be   : > { %1029 = vrot.lane.b32.xlu0 %v2123_v30, %s1687_s27 }
 0x2c0   : > { %1055 = vrot.lane.b32.xlu1 %v2130_v25, %s1689_s28 }
 0x2c2   : > { %1045 = vrot.lane.b32.xlu0 %v2106_v10, %s1689_s28 }
 0x2c4   : > { %1075 = vrot.lane.b32.xlu1 %v2113_v9, %s1692_s29 }
 0x2c6   : > { %1021 = vrot.lane.b32.xlu0 %v2106_v10, %s1687_s27 }
 0x2c8   : > { %1025 = vrot.lane.b32.xlu1 %v2116_v8, %s1687_s27 }
 0x2ca   : > { %1001 = vrot.lane.b32.xlu0 %v2116_v8, %s1686_s26 }
 0x2cc   : > { %1031 = vrot.lane.b32.xlu1 %v2130_v25, %s1687_s27 }
 0x2ce   : > { %997 = vrot.lane.b32.xlu0 %v2106_v10, %s1686_s26 }
 0x2d0   : > { %1051 = vrot.lane.b32.xlu1 %v2113_v9, %s1689_s28 }
 0x2d2   : > { %1003 = vrot.lane.b32.xlu0 %v2113_v9, %s1686_s26 }
 0x2d4   : > { %1027 = vrot.lane.b32.xlu1 %v2113_v9, %s1687_s27  ;;  %s432_s27 = scalar_lea.vmem %s2500_s11, %s1807_s15 }
 0x2d6   : > { %1173 = vrot.lane.b32.xlu0 %v2098_v16, %s2503_s30 }
 0x2d8   : > { %1007 = vrot.lane.b32.xlu1 %v2130_v25, %s1686_s26 }
 0x2da   : > { %1179 = vrot.lane.b32.xlu0 %v2123_v30, %s2503_s30 }
 0x2dc   : > { %999 = vrot.lane.b32.xlu1 %v2098_v16, %s1686_s26 }
 0x2de   : > { %1151 = vrot.lane.b32.xlu0 %v2116_v8, %s1698_s13 }
 0x2e0   : > { %1005 = vrot.lane.b32.xlu1 %v2123_v30, %s1686_s26 }
 0x2e2   : > { %1171 = vrot.lane.b32.xlu0 %v2106_v10, %s2503_s30 }
 0x2e4   : > { %1175 = vrot.lane.b32.xlu1 %v2116_v8, %s2503_s30 }
 0x2e6   : > { %1392 = vperm.xlu0 %1633, %v1389_v18  }
 0x2e8   : > { %1181 = vrot.lane.b32.xlu1 %v2130_v25, %s2503_s30 }
 0x2ec   : > { %1157 = vrot.lane.b32.xlu1 %v2130_v25, %s1698_s13 }
 0x2f0   : > { %1177 = vrot.lane.b32.xlu1 %v2113_v9, %s2503_s30 }
 0x2fe   : > { %v1126_v46 = vpop.permute.xlu1 %1125 }
 0x300   : > { %v1148_v47 = vpop.permute.xlu0 %1147 }
 0x302   : > { %v1128_v31 = vpop.permute.xlu1 %1127 }
 0x304   : > { %v1154_v35 = vpop.permute.xlu0 %1153 }
 0x305   : > { %v1159_v39 = vsel %vm565_vm7, %v1148_v47, %v1154_v35  ;;  %v1162_v6 = vsel %vm565_vm7, %v1154_v35, %v1148_v47 }
 0x306   : > { %v1132_v36 = vpop.permute.xlu1 %1131  ;;  %v1165_v21 = vmul.f32 %v1159_v39, %v1964_v0  ;;  %v1166_v14 = vmul.f32 %v1162_v6, %v1967_v48 }
 0x307   : > { %v1136_v13 = vsel %vm548_vm6, %v1126_v46, %v1132_v36  ;;  %v1139_v27 = vsel %vm548_vm6, %v1132_v36, %v1126_v46 }
 0x308   : > { %v1102_v42 = vpop.permute.xlu0 %1101  ;;  %v2241_v7 = vmul.f32 %v1136_v13, %v1942_v34  ;;  %v2244_v17 = vmul.f32 %v1139_v27, %v1954_v56  ;;  %v1338_v26 = vrot.slane %v1165_v21, 1  ;;  %v1339_v60 = vrot.slane %v1166_v14, 1 }
 0x309   : > { %v2278_v13 = vmul.f32 %v2098_v16, %v1861_v40  ;;  %v2292_v16 = vmul.f32 %v2123_v30, %v1864_v41 }
 0x30a   : > { %v1134_v61 = vpop.permute.xlu1 %1133  ;;  %v1317_v53 = vrot.slane %v2241_v7, 2  ;;  %v1319_v59 = vrot.slane %v2244_v17, 2 }
 0x30b   : > { %v1137_v12 = vsel %vm548_vm6, %v1128_v31, %v1134_v61  ;;  %v1140_v28 = vsel %vm548_vm6, %v1134_v61, %v1128_v31 }
 0x30c   : > { %v1108_v33 = vpop.permute.xlu0 %1107  ;;  %v1145_v55 = vmul.f32 %v1137_v12, %v1942_v34  ;;  %v1146_v63 = vmul.f32 %v1140_v28, %v1954_v56 }
 0x30d   : > { %v1112_v27 = vsel %vm531_vm5, %v1102_v42, %v1108_v33 }
 0x30e   : > { %v1150_v2 = vpop.permute.xlu1 %1149  ;;  %v1321_v38 = vrot.slane %v1145_v55, 2  ;;  %v1323_v62 = vrot.slane %v1146_v63, 2  ;;  %v1115_v55 = vsel %vm531_vm5, %v1108_v33, %v1102_v42  ;;  %v1097_v42 = vmul.f32 %v2116_v8, %v1861_v40 }
 0x30f   : > { %v1119_v33 = vmul.f32 %v1112_v27, %v1933_v24 }
 0x310   : > { %v1124_v3 = vpop.permute.xlu0 %1123  ;;  %v1324_v15 = vsel %vm1314_vm11, %v1319_v59, %v1323_v62  ;;  %v1322_v20 = vsel %vm1314_vm11, %v1317_v53, %v1321_v38  ;;  %v1098_v38 = vmul.f32 %v2130_v25, %v1864_v41  ;;  %v1120_v62 = vmul.f32 %v1115_v55, %v1938_v32 }
 0x311   : > { %v1367_v47 = vsel %vm1337_vm12, %v1324_v15, %v1339_v60  ;;  %v1366_v35 = vsel %vm1337_vm12, %v1322_v20, %v1338_v26  ;;  %v1273_v20 = vrot.slane %v2292_v16, 4 }
 0x312   : > { %v1156_v22 = vpop.permute.xlu1 %1155 }
 0x313   : > { %v1160_v37 = vsel %vm565_vm7, %v1150_v2, %v1156_v22  ;;  %v1163_v23 = vsel %vm565_vm7, %v1156_v22, %v1150_v2 }
 0x314   : > { %v1100_v1 = vpop.permute.xlu0 %1099  ;;  %v2255_v29 = vmul.f32 %v1160_v37, %v1964_v0  ;;  %v2258_v19 = vmul.f32 %v1163_v23, %v1967_v48  ;;  %v1271_v37 = vrot.slane %v2278_v13, 4 }
 0x316   : > { %v1340_v45 = vrot.slane %v2255_v29, 1  ;;  %v1342_v11 = vrot.slane %v2258_v19, 1  ;;  %v1104_v18 = vpop.permute.xlu1 %1103 }
 0x318   : > { %v1072_v44 = vpop.permute.xlu0 %1071  ;;  %v1343_v46 = vsel %vm1337_vm12, %v1339_v60, %v1342_v11  ;;  %v1341_v31 = vsel %vm1337_vm12, %v1338_v26, %v1340_v45  ;;  %v1277_v26 = vrot.slane %v1098_v38, 4  ;;  %v1275_v60 = vrot.slane %v1097_v42, 4 }
 0x319   : > { %v1383_v36 = vpack.c.bf16 %v1343_v46, %v1367_v47  ;;  %v1382_v61 = vpack.c.bf16 %v1341_v31, %v1366_v35  ;;  %v1296_v46 = vrot.slane %v1120_v62, 3 }
 0x31a   : > { %v1110_v12 = vpop.permute.xlu1 %1109 }
 0x31b   : > { %v1113_v63 = vsel %vm531_vm5, %v1104_v18, %v1110_v12  ;;  %v1116_v2 = vsel %vm531_vm5, %v1110_v12, %v1104_v18  ;;  %1413 = vmatprep.subr.bf16.mxu0 %v1383_v36  ;;  %v1294_v18 = vrot.slane %v1119_v33, 3 }
 0x31c   : > { %v1078_v28 = vpop.permute.xlu0 %1077  ;;  %v1121_v39 = vmul.f32 %v1113_v63, %v1933_v24  ;;  %v1122_v6 = vmul.f32 %v1116_v2, %v1938_v32  ;;  %1414 = vmatpush1.bf16.msra.mxu0 %v1382_v61 }
 0x31d   : > { %v1085_v7 = vsel %vm501_vm4, %v1078_v28, %v1072_v44 }
 0x31e   : > { %v1130_v21 = vpop.permute.xlu1 %1129  ;;  %v1298_v23 = vrot.slane %v1121_v39, 3  ;;  %v1300_v25 = vrot.slane %v1122_v6, 3 }
 0x31f   : > { %v1135_v22 = vsel %vm548_vm6, %v1124_v3, %v1130_v21  ;;  %v1138_v30 = vsel %vm548_vm6, %v1130_v21, %v1124_v3  ;;  %vm1268_vm6 = vcmask 1043456  }
 0x320   : > { %v2300_v14 = vpop.permute.xlu0 %1047  ;;  %v1141_v15 = vmul.f32 %v1135_v22, %v1942_v34  ;;  %v1142_v8 = vmul.f32 %v1138_v30, %v1954_v56  ;;  %v1301_v12 = vsel %vm1291_vm13, %v1296_v46, %v1300_v25  ;;  %v1299_v27 = vsel %vm1291_vm13, %v1294_v18, %v1298_v23 }
 0x321   : > { %v1278_v16 = vsel %vm1268_vm6, %v1273_v20, %v1277_v26  ;;  %v1276_v17 = vsel %vm1268_vm6, %v1271_v37, %v1275_v60  ;;  %v1094_v30 = vmul.f32 %v2113_v9, %v1864_v41  ;;  %v1093_v23 = vmul.f32 %v2106_v10, %v1861_v40 }
 0x322   : > { %v1315_v47 = vrot.slane %v1141_v15, 2  ;;  %v1316_v31 = vrot.slane %v1142_v8, 2  ;;  %v1106_v35 = vpop.permute.xlu1 %1105 }
 0x323   : > { %v1111_v3 = vsel %vm531_vm5, %v1100_v1, %v1106_v35  ;;  %v1114_v61 = vsel %vm531_vm5, %v1106_v35, %v1100_v1  ;;  %v1270_v40 = vrot.slane %v1094_v30, 4  ;;  %v1269_v10 = vrot.slane %v1093_v23, 4 }
 0x324   : > { %v1054_v36 = vpop.permute.xlu0 %1053  ;;  %v1117_v34 = vmul.f32 %v1111_v3, %v1933_v24  ;;  %v1118_v56 = vmul.f32 %v1114_v61, %v1938_v32  ;;  %v1320_v55 = vsel %vm1314_vm11, %v1316_v31, %v1319_v59  ;;  %v1365_v63 = vsel %vm1314_vm11, %v1301_v12, %v1316_v31 }
 0x325   : > { %v1318_v2 = vsel %vm1314_vm11, %v1315_v47, %v1317_v53  ;;  %v1364_v1 = vsel %vm1314_vm11, %v1299_v27, %v1315_v47  ;;  %v1082_v59 = vsel %vm501_vm4, %v1072_v44, %v1078_v28  ;;  %v1381_v38 = vpack.c.bf16 %v1320_v55, %v1365_v63 }
 0x326   : > { %v1292_v39 = vrot.slane %v1117_v34, 3  ;;  %v1293_v24 = vrot.slane %v1118_v56, 3  ;;  %v1074_v6 = vpop.permute.xlu1 %1073  ;;  %v1380_v53 = vpack.c.bf16 %v1318_v2, %v1364_v1  ;;  %v1089_v44 = vmul.f32 %v1085_v7, %v1917_v4 }
 0x327   : > { %1415 = vmatprep.subr.bf16.mxu0 %v1381_v38  ;;  %v1090_v28 = vmul.f32 %v1082_v59, %v1920_v5  ;;  %v1274_v56 = vsel %vm1268_vm6, %v1270_v40, %v1273_v20  ;;  %v1272_v27 = vsel %vm1268_vm6, %v1269_v10, %v1271_v37  ;;  %v1058_v63 = vsel %vm484_vm3, %v2300_v14, %v1054_v36 }
 0x328   : > { %v1070_v32 = vpop.permute.xlu0 %1069  ;;  %v1297_v42 = vsel %vm1291_vm13, %v1293_v24, %v1296_v46  ;;  %v1363_v33 = vsel %vm1291_vm13, %v1278_v16, %v1293_v24  ;;  %v1295_v62 = vsel %vm1291_vm13, %v1292_v39, %v1294_v18  ;;  %v1362_v21 = vsel %vm1291_vm13, %v1276_v17, %v1292_v39  ;;  %1416 = vmatpush1.bf16.msra.mxu0 %v1380_v53 }
 0x329   : > { %v1379_v22 = vpack.c.bf16 %v1297_v42, %v1363_v33  ;;  %v1378_v8 = vpack.c.bf16 %v1295_v62, %v1362_v21  ;;  %v1248_v18 = vrot.slane %v1089_v44, 5  ;;  %v1250_v46 = vrot.slane %v1090_v28, 5 }
 0x32a   : > { %v1080_v25 = vpop.permute.xlu1 %1079  ;;  %v1061_v2 = vsel %vm484_vm3, %v1054_v36, %v2300_v14  ;;  %v1066_v59 = vmul.f32 %v1058_v63, %v1899_v58  ;;  %vm1223_vm5 = vcmask 1041408  }
 0x32b   : > { %v1083_v26 = vsel %vm501_vm4, %v1074_v6, %v1080_v25  ;;  %v1086_v60 = vsel %vm501_vm4, %v1080_v25, %v1074_v6  ;;  %1417 = vmatprep.subr.bf16.mxu0 %v1379_v22  ;;  %v1065_v17 = vmul.f32 %v1061_v2, %v1896_v57 }
 0x32c   : > { %v1024_v15 = vpop.permute.xlu0 %1023  ;;  %v1091_v41 = vmul.f32 %v1086_v60, %v1917_v4  ;;  %v1092_v9 = vmul.f32 %v1083_v26, %v1920_v5  ;;  %1418 = vmatpush1.bf16.msra.mxu0 %v1378_v8  ;;  %v1228_v22 = vrot.slane %v1066_v59, 6 }
 0x32d   : > { %v1226_v21 = vrot.slane %v1065_v17, 6 }
 0x32e   : > { %v1252_v47 = vrot.slane %v1091_v41, 5  ;;  %v1254_v31 = vrot.slane %v1092_v9, 5  ;;  %v1050_v35 = vpop.permute.xlu1 %1049 }
 0x330   : > { %v1030_v3 = vpop.permute.xlu0 %1029  ;;  %v1255_v61 = vsel %vm669_vm9, %v1250_v46, %v1254_v31  ;;  %v1253_v34 = vsel %vm669_vm9, %v1248_v18, %v1252_v47 }
 0x331   : > { %v1361_v12 = vsel %vm1268_vm6, %v1255_v61, %v1270_v40  ;;  %v1360_v55 = vsel %vm1268_vm6, %v1253_v34, %v1269_v10  ;;  %v1034_v41 = vsel %vm467_vm1, %v1024_v15, %v1030_v3  ;;  %v1037_v9 = vsel %vm467_vm1, %v1030_v3, %v1024_v15 }
 0x332   : > { %v1056_v1 = vpop.permute.xlu1 %1055  ;;  %v1377_v24 = vpack.c.bf16 %v1274_v56, %v1361_v12  ;;  %v1376_v20 = vpack.c.bf16 %v1272_v27, %v1360_v55  ;;  %v1042_v61 = vmul.f32 %v1034_v41, %v1884_v51 }
 0x333   : > { %v1059_v6 = vsel %vm484_vm3, %v1050_v35, %v1056_v1  ;;  %v1062_v13 = vsel %vm484_vm3, %v1056_v1, %v1050_v35  ;;  %v1041_v35 = vmul.f32 %v1037_v9, %v1881_v50 }
 0x334   : > { %v1046_v39 = vpop.permute.xlu0 %1045  ;;  %v1067_v37 = vmul.f32 %v1062_v13, %v1896_v57  ;;  %v1068_v16 = vmul.f32 %v1059_v6, %v1899_v58  ;;  %1419 = vmatprep.subr.bf16.mxu0 %v1377_v24  ;;  %v1205_v1 = vrot.slane %v1042_v61, 7 }
 0x335   : > { %1420 = vmatpush1.bf16.msra.mxu0 %v1376_v20  ;;  %v1203_v2 = vrot.slane %v1041_v35, 7 }
 0x336   : > { %v1076_v14 = vpop.permute.xlu1 %1075  ;;  %v1230_v36 = vrot.slane %v1067_v37, 6  ;;  %v1232_v7 = vrot.slane %v1068_v16, 6 }
 0x337   : > { %v1081_v38 = vsel %vm501_vm4, %v1070_v32, %v1076_v14  ;;  %v1084_v53 = vsel %vm501_vm4, %v1076_v14, %v1070_v32 }
 0x338   : > { %v1087_v42 = vmul.f32 %v1084_v53, %v1917_v4  ;;  %v1088_v33 = vmul.f32 %v1081_v38, %v1920_v5  ;;  %v1022_v62 = vpop.permute.xlu0 %1021  ;;  %v1233_v28 = vsel %vm1223_vm5, %v1228_v22, %v1232_v7  ;;  %v1231_v25 = vsel %vm1223_vm5, %v1226_v21, %v1230_v36 }
 0x33a   : > { %v1246_v30 = vrot.slane %v1087_v42, 5  ;;  %v1247_v23 = vrot.slane %v1088_v33, 5  ;;  %v1026_v44 = vpop.permute.xlu1 %1025 }
 0x33c   : > { %v1251_v8 = vsel %vm669_vm9, %v1247_v23, %v1250_v46  ;;  %v1359_v26 = vsel %vm669_vm9, %v1233_v28, %v1247_v23  ;;  %v1249_v32 = vsel %vm669_vm9, %v1246_v30, %v1248_v18  ;;  %v1358_v4 = vsel %vm669_vm9, %v1231_v25, %v1246_v30  ;;  %v1002_v40 = vpop.permute.xlu0 %1001 }
 0x33d   : > { %v1375_v5 = vpack.c.bf16 %v1251_v8, %v1359_v26  ;;  %v1374_v60 = vpack.c.bf16 %v1249_v32, %v1358_v4 }
 0x33e   : > { %v1032_v10 = vpop.permute.xlu1 %1031 }
 0x33f   : > { %v1035_v47 = vsel %vm467_vm1, %v1026_v44, %v1032_v10  ;;  %v1038_v46 = vsel %vm467_vm1, %v1032_v10, %v1026_v44  ;;  %1421 = vmatprep.subr.bf16.mxu0 %v1375_v5 }
 0x340   : > { %v1043_v18 = vmul.f32 %v1038_v46, %v1881_v50  ;;  %v1044_v31 = vmul.f32 %v1035_v47, %v1884_v51  ;;  %1422 = vmatpush1.bf16.msra.mxu0 %v1374_v60  ;;  %v998_v27 = vpop.permute.xlu0 %997 }
 0x342   : > { %v1052_v34 = vpop.permute.xlu1 %1051  ;;  %v1207_v15 = vrot.slane %v1043_v18, 7  ;;  %v1209_v3 = vrot.slane %v1044_v31, 7 }
 0x343   : > { %v1057_v56 = vsel %vm484_vm3, %v1046_v39, %v1052_v34  ;;  %v1060_v12 = vsel %vm484_vm3, %v1052_v34, %v1046_v39 }
 0x344   : > { %v1063_v55 = vmul.f32 %v1060_v12, %v1896_v57  ;;  %v1064_v63 = vmul.f32 %v1057_v56, %v1899_v58  ;;  %v1210_v16 = vsel %vm712_vm0, %v1205_v1, %v1209_v3  ;;  %v1208_v39 = vsel %vm712_vm0, %v1203_v2, %v1207_v15  ;;  %v1004_v38 = vpop.permute.xlu0 %1003 }
 0x345   : > { %v1009_v4 = vsel %vm450_vm2, %v998_v27, %v1004_v38  ;;  %v1012_v5 = vsel %vm450_vm2, %v1004_v38, %v998_v27  ;;  %v1700_v56 = vmov 65535   ;;  %v1673_v27 = vld [vmem:[%s2492_s3 + $0x10] ss:$0 sm:$0xff] }
 0x346   : > { %v1224_v24 = vrot.slane %v1063_v55, 6  ;;  %v1225_v20 = vrot.slane %v1064_v63, 6  ;;  %v1028_v6 = vpop.permute.xlu1 %1027  ;;  %v1016_v10 = vmul.f32 %v1009_v4, %v1889_v54  ;;  %v1405_v12 = vsel %vm1268_vm6, 4294967295, %v1700_v56  ;;  %v1674_v63 = vld [vmem:[%s2492_s3 + $0x18] ss:$0 sm:$0xff] }
 0x347   : > { %v1033_v13 = vsel %vm467_vm1, %v1022_v62, %v1028_v6  ;;  %v1036_v37 = vsel %vm467_vm1, %v1028_v6, %v1022_v62  ;;  %v1406_v6 = vsel %vm1291_vm13, %v1405_v12, 0 }
 0x348   : > { %v1039_v17 = vmul.f32 %v1036_v37, %v1881_v50  ;;  %v1040_v57 = vmul.f32 %v1033_v13, %v1884_v51  ;;  %v1229_v58 = vsel %vm1223_vm5, %v1225_v20, %v1228_v22  ;;  %v1357_v59 = vsel %vm1223_vm5, %v1210_v16, %v1225_v20  ;;  %v1174_v32 = vpop.permute.xlu0 %1173 }
 0x349   : > { %v1373_v14 = vpack.c.bf16 %v1229_v58, %v1357_v59  ;;  %v1227_v36 = vsel %vm1223_vm5, %v1224_v24, %v1226_v21  ;;  %v1356_v7 = vsel %vm1223_vm5, %v1208_v39, %v1224_v24 }
 0x34a   : > { %v1201_v53 = vrot.slane %v1039_v17, 7  ;;  %v1202_v42 = vrot.slane %v1040_v57, 7  ;;  %v1008_v33 = vpop.permute.xlu1 %1007  ;;  %v1372_v62 = vpack.c.bf16 %v1227_v36, %v1356_v7 }
 0x34b   : > { %v1011_v30 = vsel %vm450_vm2, %v1002_v40, %v1008_v33  ;;  %v1014_v50 = vsel %vm450_vm2, %v1008_v33, %v1002_v40  ;;  %1423 = vmatprep.subr.bf16.mxu0 %v1373_v14  ;;  %v1015_v40 = vmul.f32 %v1012_v5, %v1878_v49 }
 0x34c   : > { %v1019_v51 = vmul.f32 %v1014_v50, %v1878_v49  ;;  %v1020_v22 = vmul.f32 %v1011_v30, %v1889_v54  ;;  %1424 = vmatpush1.bf16.msra.mxu0 %v1372_v62  ;;  %v1206_v23 = vsel %vm712_vm0, %v1202_v42, %v1205_v1  ;;  %v1204_v28 = vsel %vm712_vm0, %v1201_v53, %v1203_v2  ;;  %v1180_v18 = vpop.permute.xlu0 %1179 }
 0x34d   : > { %v1184_v34 = vsel %vm582_vm8, %v1174_v32, %v1180_v18  ;;  %v1187_v15 = vsel %vm582_vm8, %v1180_v18, %v1174_v32 }
 0x34e   : > { %v1000_v21 = vpop.permute.xlu1 %999  ;;  %v1355_v44 = vsel %vm712_vm0, %v1020_v22, %v1202_v42  ;;  %v1354_v25 = vsel %vm712_vm0, %v1019_v51, %v1201_v53  ;;  %v1191_v55 = vmul.f32 %v1673_v27, %v1184_v34  ;;  %v1192_v2 = vmul.f32 %v1674_v63, %v1187_v15 }
 0x34f   : > { %v1371_v8 = vpack.c.bf16 %v1206_v23, %v1355_v44  ;;  %v1370_v26 = vpack.c.bf16 %v1204_v28, %v1354_v25  ;;  %v1592_v22 = vcombine.low %v2218_v52, %v2218_v52 }
 0x350   : > { %v1152_v1 = vpop.permute.xlu0 %1151 }
 0x351   : > { %1425 = vmatprep.subr.bf16.mxu0 %v1371_v8 }
 0x352   : > { %v1006_v60 = vpop.permute.xlu1 %1005  ;;  %1426 = vmatpush1.bf16.msra.mxu0 %v1370_v26 }
 0x353   : > { %v1010_v41 = vsel %vm450_vm2, %v1000_v21, %v1006_v60  ;;  %v1013_v9 = vsel %vm450_vm2, %v1006_v60, %v1000_v21 }
 0x354   : > { %v1017_v47 = vmul.f32 %v1013_v9, %v1878_v49  ;;  %v1018_v46 = vmul.f32 %v1010_v41, %v1889_v54  ;;  %v1172_v36 = vpop.permute.xlu0 %1171 }
 0x356   : > { %v1176_v31 = vpop.permute.xlu1 %1175  ;;  %v1369_v35 = vpack.c.bf16 %v1018_v46, %v1016_v10  ;;  %v1368_v61 = vpack.c.bf16 %v1017_v47, %v1015_v40 }
 0x358   : > { %1427 = vmatprep.subr.bf16.mxu0 %v1369_v35 }
 0x359   : > { %1428 = vmatpush1.bf16.msra.mxu0 %v1368_v61 }
 0x35a   : > { %v1182_v3 = vpop.permute.xlu1 %1181 }
 0x35b   : > { %v1185_v49 = vsel %vm582_vm8, %v1176_v31, %v1182_v3  ;;  %v1188_v54 = vsel %vm582_vm8, %v1182_v3, %v1176_v31 }
 0x35c   : > { %v1193_v24 = vmul.f32 %v1673_v27, %v1185_v49  ;;  %v1194_v20 = vmul.f32 %v1674_v63, %v1188_v54  ;;  %v1485_v54 = vld [vmem:[%s2498_s9] sm:$0xff] }
 0x35e   : > { %v1386_v13 = vpack.c.bf16 %v1193_v24, %v1191_v55  ;;  %v1387_v37 = vpack.c.bf16 %v1194_v20, %v1192_v2  ;;  %v1158_v16 = vpop.permute.xlu1 %1157  ;;  %v1489_v2 = vld [vmem:[%s2499_s10] sm:$0xff] }
 0x35f   : > { %v1161_v39 = vsel %vm565_vm7, %v1152_v1, %v1158_v16  ;;  %v1164_v17 = vsel %vm565_vm7, %v1158_v16, %v1152_v1  ;;  %v1490_v1 = vld [vmem:[%s2499_s10 + $0x8] sm:$0xff] }
 0x360   : > { %v1169_v57 = vmul.f32 %v1161_v39, %v1964_v0  ;;  %v1170_v58 = vmul.f32 %v1164_v17, %v1967_v48  ;;  %v1411_v59 = vand.u32 %v1406_v6, %v1387_v37  ;;  %v1408_v14 = vand.u32 %v1406_v6, %v1386_v13 }
 0x361   : > { %v1393_v21 = vpop.permute.xlu0 %1392 }
 0x362   : > { %v1344_v7 = vrot.slane %v1169_v57, 1  ;;  %v1346_v38 = vrot.slane %v1170_v58, 1  ;;  %v1178_v53 = vpop.permute.xlu1 %1177  ;;  %1441 = vmatprep.subr.bf16.mxu0 %v1411_v59 }
 0x363   : > { %v1183_v42 = vsel %vm582_vm8, %v1172_v36, %v1178_v53  ;;  %v1186_v33 = vsel %vm582_vm8, %v1178_v53, %v1172_v36  ;;  %1442 = vmatpush2.bf16.msra.mxu0 %v1408_v14 }
 0x364   : > { %v1189_v62 = vmul.f32 %v1673_v27, %v1183_v42  ;;  %v1190_v30 = vmul.f32 %v1674_v63, %v1186_v33  ;;  %v1347_v0 = vsel %vm1337_vm12, %v1342_v11, %v1346_v38  ;;  %v1345_v48 = vsel %vm1337_vm12, %v1340_v45, %v1344_v7  ;;  %v1486_v27 = vld [vmem:[%s2498_s9 + $0x8] sm:$0xff] }
 0x366   : > { %v1385_v50 = vpack.c.bf16 %v1190_v30, %v1347_v0  ;;  %v1384_v51 = vpack.c.bf16 %v1189_v62, %v1345_v48 }
 0x368   : > { %1443 = vmatprep.subr.bf16.mxu0 %v1385_v50 }
 0x369   : > { %1444 = vmatpush2.bf16.msra.mxu0 %v1384_v51 }
 0x36c   : > { %1446 = vmatmul.mubr.bf16.vlgmr.msra.gmra.mxu0 %v1592_v22 }
 0x42c   : > { %v1447_v43 = vpop.f32.mrf.mxu0 }
 0x42d   : > { %v1448_v44 = vadd.f32 %v1447_v43, %v1393_v21 }
 0x42e   : > { %v1449_v23 = vpop.f32.mrf.mxu0 }
 0x42f   : > { %v1450_v28 = vadd.f32 %v1449_v23, %v1393_v21 }
 0x430   : > { %v1451_v19 = vpop.f32.mrf.mxu0 }
 0x431   : > { %v1454_v25 = vadd.f32 %v1450_v28, %v1448_v44 }
 0x432   : > { %v1452_v11 = vpop.f32.mrf.mxu0 }
 0x433   : > { %1455 = vadd.xlane.f32.xlu1 %v1454_v25 }
 0x4bc   : > { %v1456_v29 = vpop.xlane.xlu1 %1455 }
 0x4bd   : > { %v1457_v8 = vmul.f32 0.00390625, %v1456_v29 }
 0x4bf   : > { %v1458_v45 = vrot.slane %v1457_v8, 4 }
 0x4c1   : > { %v1459_v26 = vadd.f32 %v1458_v45, %v1457_v8 }
 0x4c3   : > { %v1460_v32 = vrot.slane %v1459_v26, 2 }
 0x4c5   : > { %v1461_v4 = vadd.f32 %v1460_v32, %v1459_v26 }
 0x4c7   : > { %v1462_v5 = vrot.slane %v1461_v4, 1 }
 0x4c9   : > { %v1463_v60 = vadd.f32 %v1462_v5, %v1461_v4 }
 0x4cb   : > { %v1465_v52 = vmul.f32 0.125, %v1463_v60 }
 0x4cd   : > { %v1466_v41 = vsub.f32 %v1448_v44, %v1465_v52  ;;  %v1467_v9 = vsub.f32 %v1450_v28, %v1465_v52 }
 0x4cf   : > { %v1468_v40 = vmul.f32 %v1466_v41, %v1466_v41  ;;  %v1469_v10 = vmul.f32 %v1467_v9, %v1467_v9 }
 0x4d1   : > { %v1470_v47 = vadd.f32 %v1469_v10, %v1468_v40 }
 0x4d3   : > { %1471 = vadd.xlane.f32.xlu0 %v1470_v47 }
 0x55c   : > { %v1472_v46 = vpop.xlane.xlu0 %1471 }
 0x55d   : > { %v1473_v18 = vmul.f32 0.00390625, %v1472_v46 }
 0x55f   : > { %v1474_v31 = vrot.slane %v1473_v18, 4 }
 0x561   : > { %v1475_v35 = vadd.f32 %v1474_v31, %v1473_v18 }
 0x563   : > { %v1476_v61 = vrot.slane %v1475_v35, 2 }
 0x565   : > { %v1477_v34 = vadd.f32 %v1476_v61, %v1475_v35 }
 0x567   : > { %v1478_v15 = vrot.slane %v1477_v34, 1 }
 0x569   : > { %v1479_v3 = vadd.f32 %v1478_v15, %v1477_v34 }
 0x56b   : > { %v1480_v56 = vmul.f32 0.125, %v1479_v3 }
 0x56d   : > { %v1481_v12 = vadd.f32 1e-05, %v1480_v56 }
 0x56f   : > { %1671 = vrsqrt.f32 %v1481_v12 }
 0x57c   : > { %v1672_v49 = vpop.eup %1671 }
 0x57d   : > { %v1483_v55 = vmul.f32 %v1672_v49, %v1466_v41  ;;  %v1484_v63 = vmul.f32 %v1672_v49, %v1467_v9 }
 0x57f   : > { %v1487_v24 = vmul.f32 %v1485_v54, %v1483_v55  ;;  %v1488_v20 = vmul.f32 %v1486_v27, %v1484_v63 }
 0x581   : > { %v1491_v6 = vadd.f32 %v1489_v2, %v1487_v24  ;;  %v1492_v13 = vadd.f32 %v1490_v1, %v1488_v20 }
 0x583   : > { %1493 = vst [vmem:[%s432_s27] sm:$0xff] %v1491_v6  ;;  %1494 = vst [vmem:[%s432_s27 + $0x8] sm:$0xff] %v1492_v13 }
 0x584 PF: > { %s21_s17 = sadd.s32 1, %s1681_s17  }
 0x585   : > { %p18_p4 = scmp.ge.s32.totalorder %s21_s17, 4  }
 0x587   :  { %20 = sbr.rel (!%p18_p4) target bundleno = 1 (0x1), region = 100 }

</bundles_post_ra>
